<compile_context>
chip_gen: v5e
topology: v5e:2x2
jax: 0.10.0
libtpu: 0.0.40
codegen_flags: <defaults>
</compile_context>

<pallas_src>
import jax
import jax.numpy as jnp
from jax.experimental import pallas as pl
from jax.experimental.pallas import tpu as pltpu


# ----------------------------- config ---------------------------------------
B = 2                                   # batch
MOD_SHAPES = [(4, 8, 8), (4, 8, 8)]     # two NCHW modalities (C, H, W)
LATENT_DIMS = [32, 32]                  # latent_dim_sizes
CLIN_DIM = 16                           # clinical_params_size
MMTM_REDUCTION = 4

D_MOD = [c * h * w for (c, h, w) in MOD_SHAPES]          # [256, 256]
TOTAL_DIM = sum(LATENT_DIMS) + CLIN_DIM                  # 80
BOTTLENECK = max(1, TOTAL_DIM // MMTM_REDUCTION)         # 20
FUSED_DIM = sum(LATENT_DIMS) + 128                       # 192 (classifier in)


def _round_up(x, m):
    return ((x + m - 1) // m) * m


IN_DIM = _round_up(sum(D_MOD) + CLIN_DIM, 128)           # 640 (x1|x2|xp|0)
FEAT = 128                                               # lane-dense latent slab
OUT_PAD = 128                                            # lane-dense output slab

# column layout inside the (TM, FEAT) latent slab U / fused
C_M1 = 0                                  # mu1 : cols  0:32
C_M2 = LATENT_DIMS[0]                     # mu2 : cols 32:64
C_XP = LATENT_DIMS[0] + LATENT_DIMS[1]    # xp  : cols 64:80
C_END = TOTAL_DIM                         # 80 ; cols 80:128 are zero

# row layout of the packed 128-wide bf16 weight slab (all offsets % 128 == 0)
R_ENC0, R_ENC1 = 0, IN_DIM                      # block-diag encoders   640x128
R_SQ0,  R_SQ1  = R_ENC1, R_ENC1 + FEAT          # MMTM squeeze          128x128
R_EXC0, R_EXC1 = R_SQ1,  R_SQ1 + FEAT           # MMTM excitations      128x128
R_PP30, R_PP31 = R_EXC1, R_EXC1 + 256           # param_post layer 3    256x128
R_C1A0, R_C1A1 = R_PP31, R_PP31 + FEAT          # classifier-1 (f1|f2)  128x128
R_C1B0, R_C1B1 = R_C1A1, R_C1A1 + FEAT          # classifier-1 (pp)     128x128
R_C20,  R_C21  = R_C1B1, R_C1B1 + FEAT          # classifier-2 (->64)   128x128
R_C30,  R_C31  = R_C21,  R_C21 + FEAT           # classifier-3 (->1)    128x128
W128_ROWS = R_C31                               # 1664


# ----------------------------- kernel ---------------------------------------
def fusion_kernel(xin_ref, w128_ref, pp1_ref, pp2_ref, bias_ref, out_ref):
    f32, bf16 = jnp.float32, jnp.bfloat16

    def mm(a_bf, w):
        # bf16 MXU inputs, f32 accumulation
        return jnp.dot(a_bf, w, preferred_element_type=f32)

    xin = xin_ref[...]                                        # (TM, 640) bf16

    # ---- frozen modality encoders + xp pass-through (block-diagonal) ----
    U = mm(xin, w128_ref[R_ENC0:R_ENC1, :])                   # (TM,128) f32 = mu1|mu2|xp|0
    U_bf = U.astype(bf16)                                     # single cast, reused

    # ---- MMTM squeeze (bottleneck 20, zero-padded to 128 lanes) ----
    z = jnp.maximum(mm(U_bf, w128_ref[R_SQ0:R_SQ1, :]) + bias_ref[0:1, 0:128], 0.0)

    # ---- MMTM excitations: three Linears fused into one (128,128) matmul ----
    e = jax.nn.sigmoid(mm(z.astype(bf16), w128_ref[R_EXC0:R_EXC1, :])
                       + bias_ref[1:2, 0:128])
    fused = U * e + U                                         # f1|f2|fp|0 (f32)
    fused_bf = fused.astype(bf16)                             # single cast, reused

    # ---- param_post MLP on fp: 16 -> 512 -> 256 -> 128 (zero-row-padded L1) ----
    h = jnp.maximum(mm(fused_bf, pp1_ref[...]) + bias_ref[2:3, 0:512], 0.0)
    h = jnp.maximum(mm(h.astype(bf16), pp2_ref[...]) + bias_ref[3:4, 0:256], 0.0)
    pp = mm(h.astype(bf16), w128_ref[R_PP30:R_PP31, :]) + bias_ref[4:5, 0:128]

    # ---- classifier: (f1|f2 | params_post) -> 128 -> 64 -> 1 (no concat) ----
    h = jnp.maximum(
        mm(fused_bf, w128_ref[R_C1A0:R_C1A1, :])
        + mm(pp.astype(bf16), w128_ref[R_C1B0:R_C1B1, :])
        + bias_ref[5:6, 0:128], 0.0)
    # Dropout(0.5): identity in eval mode
    h = jnp.maximum(mm(h.astype(bf16), w128_ref[R_C20:R_C21, :])
                    + bias_ref[6:7, 0:128], 0.0)
    # Dropout(0.5): identity in eval mode
    out = mm(h.astype(bf16), w128_ref[R_C30:R_C31, :]) + bias_ref[7:8, 0:128]
    out_ref[...] = out.astype(out_ref.dtype)                  # col 0 = logit


# ----------------------------- wrapper ---------------------------------------
def _choose_tile(b):
    # bf16 sublane tile is 16 -> never pad a tiny batch beyond 16 rows.
    # For larger batches keep >=2 grid steps (v7x dual-TC) and cap at 256.
    if b <= 16:
        return 16
    half = _round_up(_round_up(b, 16) // 2, 16)
    return max(16, min(256, half))


def fusion_forward(x_mod1, x_mod2, x_params, kp):
    """Fused encoders + MMTM + param_post + classifier in one Pallas call."""
    b = x_mod1.shape[0]
    x1 = x_mod1.reshape(b, -1)
    x2 = x_mod2.reshape(b, -1)
    xp = x_params
    pad_cols = IN_DIM - (x1.shape[1] + x2.shape[1] + xp.shape[1])
    xin = jnp.concatenate(
        [x1, x2, xp, jnp.zeros((b, pad_cols), x1.dtype)], axis=1
    ).astype(jnp.bfloat16)                                    # (B, 640)

    tm = _choose_tile(b)
    b_pad = _round_up(b, tm)
    if b_pad != b:
        xin = jnp.pad(xin, ((0, b_pad - b), (0, 0)))
    n_tiles = b_pad // tm

    w128, pp1, pp2, bias = kp["w128"], kp["pp1"], kp["pp2"], kp["bias"]

    def const_spec(a):
        kwargs = {}
        if n_tiles > 1:
            # weights are grid-invariant: no need for a second pipeline buffer
            kwargs["pipeline_mode"] = pl.Buffered(1)
        return pl.BlockSpec(a.shape, lambda i: (0, 0), **kwargs)

    in_specs = [
        pl.BlockSpec((tm, IN_DIM), lambda i: (i, 0)),
        const_spec(w128),
        const_spec(pp1),
        const_spec(pp2),
        const_spec(bias),
    ]
    out_spec = pl.BlockSpec((tm, OUT_PAD), lambda i: (i, 0))

    mxu_terms = (IN_DIM * FEAT + 6 * FEAT * FEAT + FEAT * 512
                 + 512 * 256 + 256 * FEAT)
    weight_bytes = (w128.size + pp1.size + pp2.size) * 2 + bias.size * 4
    cost = pl.CostEstimate(
        flops=2 * b_pad * mxu_terms,
        transcendentals=b_pad * FEAT,
        bytes_accessed=b_pad * IN_DIM * 2 + weight_bytes + b_pad * OUT_PAD * 4,
    )

    out_slab = pl.pallas_call(
        fusion_kernel,
        out_shape=jax.ShapeDtypeStruct((b_pad, OUT_PAD), jnp.float32),
        grid=(n_tiles,),
        in_specs=in_specs,
        out_specs=out_spec,
        compiler_params=pltpu.CompilerParams(
            dimension_semantics=("parallel",)
        ),
        cost_estimate=cost,
    )(xin, w128, pp1, pp2, bias)

    return out_slab[:b, :1]


# ----------------------------- params ----------------------------------------
def init_params(key):
    """Deterministic synthetic parameters (shapes match the PyTorch module)."""
    ks = iter(jax.random.split(key, 32))

    def lin(kk, din, dout, scale=0.1):
        w = jax.random.normal(kk, (din, dout), jnp.float32) * scale
        b = jax.random.normal(jax.random.fold_in(kk, 1), (1, dout), jnp.float32) * scale
        return w, b

    p = {}
    # MMTM
    p["sq_w"], p["sq_b"] = lin(next(ks), TOTAL_DIM, BOTTLENECK)
    p["e1_w"], p["e1_b"] = lin(next(ks), BOTTLENECK, LATENT_DIMS[0])
    p["e2_w"], p["e2_b"] = lin(next(ks), BOTTLENECK, LATENT_DIMS[1])
    p["e3_w"], p["e3_b"] = lin(next(ks), BOTTLENECK, CLIN_DIM)
    # param_post: 16 -> 512 -> 256 -> 128
    p["pp1_w"], p["pp1_b"] = lin(next(ks), CLIN_DIM, 512)
    p["pp2_w"], p["pp2_b"] = lin(next(ks), 512, 256)
    p["pp3_w"], p["pp3_b"] = lin(next(ks), 256, 128)
    # classifier: 192 -> 128 -> 64 -> 1
    p["c1_w"], p["c1_b"] = lin(next(ks), FUSED_DIM, 128)
    p["c2_w"], p["c2_b"] = lin(next(ks), 128, 64)
    p["c3_w"], p["c3_b"] = lin(next(ks), 64, 1)
    # stand-in frozen modality encoders (flatten NCHW -> latent)
    p["enc_w"] = []
    for (c, h, w), ld in zip(MOD_SHAPES, LATENT_DIMS):
        p["enc_w"].append(
            jax.random.normal(next(ks), (c * h * w, ld), jnp.float32) * 0.05
        )
    return p


def prepare_kernel_params(p):
    """Pack all weights/biases into 4 lane-dense slabs (bf16 weights, f32 biases).

    All padding entries are exact zeros, so the packed math is identical to the
    original concat/split formulation.
    """
    bf, f32 = jnp.bfloat16, jnp.float32
    d1, d2 = LATENT_DIMS

    # ---- (1664, 128) bf16 weight slab ----
    w = jnp.zeros((W128_ROWS, FEAT), f32)
    # block-diagonal encoders + xp identity pass-through
    w = w.at[0:D_MOD[0], C_M1:C_M1 + d1].set(p["enc_w"][0])
    w = w.at[D_MOD[0]:D_MOD[0] + D_MOD[1], C_M2:C_M2 + d2].set(p["enc_w"][1])
    xp_r0 = D_MOD[0] + D_MOD[1]
    w = w.at[xp_r0:xp_r0 + CLIN_DIM, C_XP:C_XP + CLIN_DIM].set(jnp.eye(CLIN_DIM, dtype=f32))
    # MMTM squeeze (80 -> 20, padded to 128x128)
    w = w.at[R_SQ0:R_SQ0 + TOTAL_DIM, 0:BOTTLENECK].set(p["sq_w"])
    # MMTM excitations fused into one 128x128
    w = w.at[R_EXC0:R_EXC0 + BOTTLENECK, C_M1:C_M1 + d1].set(p["e1_w"])
    w = w.at[R_EXC0:R_EXC0 + BOTTLENECK, C_M2:C_M2 + d2].set(p["e2_w"])
    w = w.at[R_EXC0:R_EXC0 + BOTTLENECK, C_XP:C_XP + CLIN_DIM].set(p["e3_w"])
    # param_post layer 3 (256 -> 128)
    w = w.at[R_PP30:R_PP31, :].set(p["pp3_w"])
    # classifier layer 1, split along the fused-concat dim (32 | 32 | 128)
    w = w.at[R_C1A0 + C_M1:R_C1A0 + C_M1 + d1, :].set(p["c1_w"][:d1])
    w = w.at[R_C1A0 + C_M2:R_C1A0 + C_M2 + d2, :].set(p["c1_w"][d1:d1 + d2])
    w = w.at[R_C1B0:R_C1B1, :].set(p["c1_w"][d1 + d2:])
    # classifier layer 2 (128 -> 64, output lanes padded to 128)
    w = w.at[R_C20:R_C21, 0:64].set(p["c2_w"])
    # classifier layer 3 (64 -> 1, rows/cols padded to 128)
    w = w.at[R_C30:R_C30 + 64, 0:1].set(p["c3_w"])
    w128 = w.astype(bf)

    # ---- pp1: (128, 512) bf16, zero rows outside the xp block ----
    pp1 = jnp.zeros((FEAT, 512), f32)
    pp1 = pp1.at[C_XP:C_XP + CLIN_DIM, :].set(p["pp1_w"])
    pp1 = pp1.astype(bf)

    # ---- pp2: (512, 256) bf16 ----
    pp2 = p["pp2_w"].astype(bf)

    # ---- (8, 512) f32 bias slab ----
    bias = jnp.zeros((8, 512), f32)
    bias = bias.at[0, 0:BOTTLENECK].set(p["sq_b"][0])
    bias = bias.at[1, C_M1:C_M1 + d1].set(p["e1_b"][0])
    bias = bias.at[1, C_M2:C_M2 + d2].set(p["e2_b"][0])
    bias = bias.at[1, C_XP:C_XP + CLIN_DIM].set(p["e3_b"][0])
    bias = bias.at[2, 0:512].set(p["pp1_b"][0])
    bias = bias.at[3, 0:256].set(p["pp2_b"][0])
    bias = bias.at[4, 0:128].set(p["pp3_b"][0])
    bias = bias.at[5, 0:128].set(p["c1_b"][0])
    bias = bias.at[6, 0:64].set(p["c2_b"][0])
    bias = bias.at[7, 0:1].set(p["c3_b"][0])

    return {"w128": w128, "pp1": pp1, "pp2": pp2, "bias": bias}


# ----------------------------- reference ------------------------------------
def reference_forward(x_mod1, x_mod2, x_params, p):
    """Plain-JAX reference in the original (concat) form, mirroring the kernel's
    bf16-input / f32-accumulate matmul precision."""
    f32, bf = jnp.float32, jnp.bfloat16

    def mm(a, w):
        return jnp.dot(a.astype(bf), w.astype(bf), preferred_element_type=f32)

    x1 = x_mod1.reshape(x_mod1.shape[0], -1)
    x2 = x_mod2.reshape(x_mod2.shape[0], -1)
    mu1 = mm(x1, p["enc_w"][0])
    mu2 = mm(x2, p["enc_w"][1])
    xp = x_params.astype(bf).astype(f32)   # mirrors the bf16 input slab

    U = jnp.concatenate([mu1, mu2, xp], axis=1)
    z = jnp.maximum(mm(U, p["sq_w"]) + p["sq_b"], 0.0)

    def excite(feat, w, b):
        return feat * jax.nn.sigmoid(mm(z, w) + b) + feat

    f1 = excite(mu1, p["e1_w"], p["e1_b"])
    f2 = excite(mu2, p["e2_w"], p["e2_b"])
    fp = excite(xp, p["e3_w"], p["e3_b"])

    h = jnp.maximum(mm(fp, p["pp1_w"]) + p["pp1_b"], 0.0)
    h = jnp.maximum(mm(h, p["pp2_w"]) + p["pp2_b"], 0.0)
    pp = mm(h, p["pp3_w"]) + p["pp3_b"]

    x = jnp.concatenate([f1, f2, pp], axis=1)
    h = jnp.maximum(mm(x, p["c1_w"]) + p["c1_b"], 0.0)
    h = jnp.maximum(mm(h, p["c2_w"]) + p["c2_b"], 0.0)
    return mm(h, p["c3_w"]) + p["c3_b"]


# ----------------------------- main ------------------------------------------
if __name__ == "__main__":
    key = jax.random.PRNGKey(0)
    k_param, k_m1, k_m2, k_clin = jax.random.split(key, 4)

    params = init_params(k_param)
    kparams = prepare_kernel_params(params)

    x_mod1 = jax.random.normal(k_m1, (B,) + MOD_SHAPES[0], jnp.float32)   # NCHW
    x_mod2 = jax.random.normal(k_m2, (B,) + MOD_SHAPES[1], jnp.float32)   # NCHW
    x_params = jax.random.normal(k_clin, (B, CLIN_DIM), jnp.float32)

    out = fusion_forward(x_mod1, x_mod2, x_params, kparams)
    out = jax.block_until_ready(out)

    ref = reference_forward(x_mod1, x_mod2, x_params, params)
    assert out.shape == (B, 1), out.shape
    assert jnp.allclose(out, ref, atol=1e-2, rtol=1e-2), (out, ref)

    print("KERNEL_OK")
</pallas_src>

<mosaic_0001>
module attributes {stable_mosaic.version = 11 : i64} {
  func.func @fusion_kernel(%arg0: i32, %arg1: memref<16x640xbf16, #tpu.memory_space<vmem>>, %arg2: memref<1664x128xbf16, #tpu.memory_space<vmem>>, %arg3: memref<128x512xbf16, #tpu.memory_space<vmem>>, %arg4: memref<512x256xbf16, #tpu.memory_space<vmem>>, %arg5: memref<8x512xf32, #tpu.memory_space<vmem>>, %arg6: memref<16x128xf32, #tpu.memory_space<vmem>>) attributes {dimension_semantics = [#tpu.dimension_semantics<parallel>], iteration_bounds = array<i64: 1>, scalar_prefetch = 0 : i64, scratch_operands = 0 : i64, tpu.core_type = #tpu.core_type<tc>, window_params = [{transform_indices = @transform_0, window_bounds = array<i64: 16, 640>}, {pipeline_mode = #tpu.pipeline_mode<synchronous>, transform_indices = @transform_1, window_bounds = array<i64: 1664, 128>}, {pipeline_mode = #tpu.pipeline_mode<synchronous>, transform_indices = @transform_2, window_bounds = array<i64: 128, 512>}, {pipeline_mode = #tpu.pipeline_mode<synchronous>, transform_indices = @transform_3, window_bounds = array<i64: 512, 256>}, {pipeline_mode = #tpu.pipeline_mode<synchronous>, transform_indices = @transform_4, window_bounds = array<i64: 8, 512>}, {transform_indices = @transform_5, window_bounds = array<i64: 16, 128>}]} {
    %c0 = arith.constant 0 : index
    %c0_0 = arith.constant 0 : index
    %0 = vector.load %arg1[%c0, %c0_0] : memref<16x640xbf16, #tpu.memory_space<vmem>>, vector<16x640xbf16>
    %c0_1 = arith.constant 0 : index
    %c0_2 = arith.constant 0 : index
    %1 = vector.load %arg2[%c0_1, %c0_2] : memref<1664x128xbf16, #tpu.memory_space<vmem>>, vector<640x128xbf16>
    %cst = arith.constant dense<0.000000e+00> : vector<16x128xf32>
    %2 = tpu.matmul %0, %1, %cst {dimension_numbers = #tpu.dot_dimension_numbers<[1], [0], [0], [1], [0, 0, 1, 1], [], []>} : vector<16x640xbf16>, vector<640x128xbf16>, vector<16x128xf32> -> vector<16x128xf32>
    %3 = arith.truncf %2 : vector<16x128xf32> to vector<16x128xbf16>
    %c640 = arith.constant 640 : index
    %c0_3 = arith.constant 0 : index
    %4 = vector.load %arg2[%c640, %c0_3] : memref<1664x128xbf16, #tpu.memory_space<vmem>>, vector<128x128xbf16>
    %cst_4 = arith.constant dense<0.000000e+00> : vector<16x128xf32>
    %5 = tpu.matmul %3, %4, %cst_4 {dimension_numbers = #tpu.dot_dimension_numbers<[1], [0], [0], [1], [0, 0, 1, 1], [], []>} : vector<16x128xbf16>, vector<128x128xbf16>, vector<16x128xf32> -> vector<16x128xf32>
    %c0_5 = arith.constant 0 : index
    %c0_6 = arith.constant 0 : index
    %6 = vector.load %arg5[%c0_5, %c0_6] : memref<8x512xf32, #tpu.memory_space<vmem>>, vector<1x128xf32>
    %7 = vector.broadcast %6 : vector<1x128xf32> to vector<16x128xf32>
    %8 = arith.addf %5, %7 : vector<16x128xf32>
    %cst_7 = arith.constant 0.000000e+00 : f32
    %9 = vector.broadcast %cst_7 : f32 to vector<16x128xf32>
    %10 = arith.maximumf %8, %9 : vector<16x128xf32>
    %11 = arith.truncf %10 : vector<16x128xf32> to vector<16x128xbf16>
    %c768 = arith.constant 768 : index
    %c0_8 = arith.constant 0 : index
    %12 = vector.load %arg2[%c768, %c0_8] : memref<1664x128xbf16, #tpu.memory_space<vmem>>, vector<128x128xbf16>
    %cst_9 = arith.constant dense<0.000000e+00> : vector<16x128xf32>
    %13 = tpu.matmul %11, %12, %cst_9 {dimension_numbers = #tpu.dot_dimension_numbers<[1], [0], [0], [1], [0, 0, 1, 1], [], []>} : vector<16x128xbf16>, vector<128x128xbf16>, vector<16x128xf32> -> vector<16x128xf32>
    %c1 = arith.constant 1 : index
    %c0_10 = arith.constant 0 : index
    %14 = vector.load %arg5[%c1, %c0_10] : memref<8x512xf32, #tpu.memory_space<vmem>>, vector<1x128xf32>
    %15 = vector.broadcast %14 : vector<1x128xf32> to vector<16x128xf32>
    %16 = arith.addf %13, %15 : vector<16x128xf32>
    %17 = arith.negf %16 : vector<16x128xf32>
    %18 = math.exp %17 : vector<16x128xf32>
    %cst_11 = arith.constant 1.000000e+00 : f32
    %19 = vector.broadcast %cst_11 : f32 to vector<16x128xf32>
    %20 = arith.addf %19, %18 : vector<16x128xf32>
    %21 = arith.divf %19, %20 : vector<16x128xf32>
    %22 = arith.mulf %2, %21 : vector<16x128xf32>
    %23 = arith.addf %22, %2 : vector<16x128xf32>
    %24 = arith.truncf %23 : vector<16x128xf32> to vector<16x128xbf16>
    %c0_12 = arith.constant 0 : index
    %c0_13 = arith.constant 0 : index
    %25 = vector.load %arg3[%c0_12, %c0_13] : memref<128x512xbf16, #tpu.memory_space<vmem>>, vector<128x512xbf16>
    %cst_14 = arith.constant dense<0.000000e+00> : vector<16x512xf32>
    %26 = tpu.matmul %24, %25, %cst_14 {dimension_numbers = #tpu.dot_dimension_numbers<[1], [0], [0], [1], [0, 0, 1, 1], [], []>} : vector<16x128xbf16>, vector<128x512xbf16>, vector<16x512xf32> -> vector<16x512xf32>
    %c2 = arith.constant 2 : index
    %c0_15 = arith.constant 0 : index
    %27 = vector.load %arg5[%c2, %c0_15] : memref<8x512xf32, #tpu.memory_space<vmem>>, vector<1x512xf32>
    %28 = vector.broadcast %27 : vector<1x512xf32> to vector<16x512xf32>
    %29 = arith.addf %26, %28 : vector<16x512xf32>
    %cst_16 = arith.constant 0.000000e+00 : f32
    %30 = vector.broadcast %cst_16 : f32 to vector<16x512xf32>
    %31 = arith.maximumf %29, %30 : vector<16x512xf32>
    %32 = arith.truncf %31 : vector<16x512xf32> to vector<16x512xbf16>
    %c0_17 = arith.constant 0 : index
    %c0_18 = arith.constant 0 : index
    %33 = vector.load %arg4[%c0_17, %c0_18] : memref<512x256xbf16, #tpu.memory_space<vmem>>, vector<512x256xbf16>
    %cst_19 = arith.constant dense<0.000000e+00> : vector<16x256xf32>
    %34 = tpu.matmul %32, %33, %cst_19 {dimension_numbers = #tpu.dot_dimension_numbers<[1], [0], [0], [1], [0, 0, 1, 1], [], []>} : vector<16x512xbf16>, vector<512x256xbf16>, vector<16x256xf32> -> vector<16x256xf32>
    %c3 = arith.constant 3 : index
    %c0_20 = arith.constant 0 : index
    %35 = vector.load %arg5[%c3, %c0_20] : memref<8x512xf32, #tpu.memory_space<vmem>>, vector<1x256xf32>
    %36 = vector.broadcast %35 : vector<1x256xf32> to vector<16x256xf32>
    %37 = arith.addf %34, %36 : vector<16x256xf32>
    %cst_21 = arith.constant 0.000000e+00 : f32
    %38 = vector.broadcast %cst_21 : f32 to vector<16x256xf32>
    %39 = arith.maximumf %37, %38 : vector<16x256xf32>
    %40 = arith.truncf %39 : vector<16x256xf32> to vector<16x256xbf16>
    %c896 = arith.constant 896 : index
    %c0_22 = arith.constant 0 : index
    %41 = vector.load %arg2[%c896, %c0_22] : memref<1664x128xbf16, #tpu.memory_space<vmem>>, vector<256x128xbf16>
    %cst_23 = arith.constant dense<0.000000e+00> : vector<16x128xf32>
    %42 = tpu.matmul %40, %41, %cst_23 {dimension_numbers = #tpu.dot_dimension_numbers<[1], [0], [0], [1], [0, 0, 1, 1], [], []>} : vector<16x256xbf16>, vector<256x128xbf16>, vector<16x128xf32> -> vector<16x128xf32>
    %c4 = arith.constant 4 : index
    %c0_24 = arith.constant 0 : index
    %43 = vector.load %arg5[%c4, %c0_24] : memref<8x512xf32, #tpu.memory_space<vmem>>, vector<1x128xf32>
    %44 = vector.broadcast %43 : vector<1x128xf32> to vector<16x128xf32>
    %45 = arith.addf %42, %44 : vector<16x128xf32>
    %c1152 = arith.constant 1152 : index
    %c0_25 = arith.constant 0 : index
    %46 = vector.load %arg2[%c1152, %c0_25] : memref<1664x128xbf16, #tpu.memory_space<vmem>>, vector<128x128xbf16>
    %cst_26 = arith.constant dense<0.000000e+00> : vector<16x128xf32>
    %47 = tpu.matmul %24, %46, %cst_26 {dimension_numbers = #tpu.dot_dimension_numbers<[1], [0], [0], [1], [0, 0, 1, 1], [], []>} : vector<16x128xbf16>, vector<128x128xbf16>, vector<16x128xf32> -> vector<16x128xf32>
    %48 = arith.truncf %45 : vector<16x128xf32> to vector<16x128xbf16>
    %c1280 = arith.constant 1280 : index
    %c0_27 = arith.constant 0 : index
    %49 = vector.load %arg2[%c1280, %c0_27] : memref<1664x128xbf16, #tpu.memory_space<vmem>>, vector<128x128xbf16>
    %cst_28 = arith.constant dense<0.000000e+00> : vector<16x128xf32>
    %50 = tpu.matmul %48, %49, %cst_28 {dimension_numbers = #tpu.dot_dimension_numbers<[1], [0], [0], [1], [0, 0, 1, 1], [], []>} : vector<16x128xbf16>, vector<128x128xbf16>, vector<16x128xf32> -> vector<16x128xf32>
    %51 = arith.addf %47, %50 : vector<16x128xf32>
    %c5 = arith.constant 5 : index
    %c0_29 = arith.constant 0 : index
    %52 = vector.load %arg5[%c5, %c0_29] : memref<8x512xf32, #tpu.memory_space<vmem>>, vector<1x128xf32>
    %53 = vector.broadcast %52 : vector<1x128xf32> to vector<16x128xf32>
    %54 = arith.addf %51, %53 : vector<16x128xf32>
    %cst_30 = arith.constant 0.000000e+00 : f32
    %55 = vector.broadcast %cst_30 : f32 to vector<16x128xf32>
    %56 = arith.maximumf %54, %55 : vector<16x128xf32>
    %57 = arith.truncf %56 : vector<16x128xf32> to vector<16x128xbf16>
    %c1408 = arith.constant 1408 : index
    %c0_31 = arith.constant 0 : index
    %58 = vector.load %arg2[%c1408, %c0_31] : memref<1664x128xbf16, #tpu.memory_space<vmem>>, vector<128x128xbf16>
    %cst_32 = arith.constant dense<0.000000e+00> : vector<16x128xf32>
    %59 = tpu.matmul %57, %58, %cst_32 {dimension_numbers = #tpu.dot_dimension_numbers<[1], [0], [0], [1], [0, 0, 1, 1], [], []>} : vector<16x128xbf16>, vector<128x128xbf16>, vector<16x128xf32> -> vector<16x128xf32>
    %c6 = arith.constant 6 : index
    %c0_33 = arith.constant 0 : index
    %60 = vector.load %arg5[%c6, %c0_33] : memref<8x512xf32, #tpu.memory_space<vmem>>, vector<1x128xf32>
    %61 = vector.broadcast %60 : vector<1x128xf32> to vector<16x128xf32>
    %62 = arith.addf %59, %61 : vector<16x128xf32>
    %cst_34 = arith.constant 0.000000e+00 : f32
    %63 = vector.broadcast %cst_34 : f32 to vector<16x128xf32>
    %64 = arith.maximumf %62, %63 : vector<16x128xf32>
    %65 = arith.truncf %64 : vector<16x128xf32> to vector<16x128xbf16>
    %c1536 = arith.constant 1536 : index
    %c0_35 = arith.constant 0 : index
    %66 = vector.load %arg2[%c1536, %c0_35] : memref<1664x128xbf16, #tpu.memory_space<vmem>>, vector<128x128xbf16>
    %cst_36 = arith.constant dense<0.000000e+00> : vector<16x128xf32>
    %67 = tpu.matmul %65, %66, %cst_36 {dimension_numbers = #tpu.dot_dimension_numbers<[1], [0], [0], [1], [0, 0, 1, 1], [], []>} : vector<16x128xbf16>, vector<128x128xbf16>, vector<16x128xf32> -> vector<16x128xf32>
    %c7 = arith.constant 7 : index
    %c0_37 = arith.constant 0 : index
    %68 = vector.load %arg5[%c7, %c0_37] : memref<8x512xf32, #tpu.memory_space<vmem>>, vector<1x128xf32>
    %69 = vector.broadcast %68 : vector<1x128xf32> to vector<16x128xf32>
    %70 = arith.addf %67, %69 : vector<16x128xf32>
    %c0_38 = arith.constant 0 : index
    %c0_39 = arith.constant 0 : index
    %71 = vector.load %arg6[%c0_38, %c0_39] : memref<16x128xf32, #tpu.memory_space<vmem>>, vector<16x128xf32>
    tpu.vector_store %arg6[%c0_38, %c0_39], %70 {strides = array<i32>} : memref<16x128xf32, #tpu.memory_space<vmem>>, vector<16x128xf32>,
    return
  }
  func.func @transform_0(%arg0: i32) -> (i32, i32) {
    %c0_i32 = arith.constant 0 : i32
    %c0_i32_0 = arith.constant 0 : i32
    return %arg0, %c0_i32 : i32, i32
  }
  func.func @transform_1(%arg0: i32) -> (i32, i32) {
    %c0_i32 = arith.constant 0 : i32
    %c0_i32_0 = arith.constant 0 : i32
    %c0_i32_1 = arith.constant 0 : i32
    return %c0_i32, %c0_i32_0 : i32, i32
  }
  func.func @transform_2(%arg0: i32) -> (i32, i32) {
    %c0_i32 = arith.constant 0 : i32
    %c0_i32_0 = arith.constant 0 : i32
    %c0_i32_1 = arith.constant 0 : i32
    return %c0_i32, %c0_i32_0 : i32, i32
  }
  func.func @transform_3(%arg0: i32) -> (i32, i32) {
    %c0_i32 = arith.constant 0 : i32
    %c0_i32_0 = arith.constant 0 : i32
    %c0_i32_1 = arith.constant 0 : i32
    return %c0_i32, %c0_i32_0 : i32, i32
  }
  func.func @transform_4(%arg0: i32) -> (i32, i32) {
    %c0_i32 = arith.constant 0 : i32
    %c0_i32_0 = arith.constant 0 : i32
    %c0_i32_1 = arith.constant 0 : i32
    return %c0_i32, %c0_i32_0 : i32, i32
  }
  func.func @transform_5(%arg0: i32) -> (i32, i32) {
    %c0_i32 = arith.constant 0 : i32
    %c0_i32_0 = arith.constant 0 : i32
    return %arg0, %c0_i32 : i32, i32
  }
}

</mosaic_0001>

<bundles_post_ra>
// kernel: tpu_custom_call.1
= control target key start
LH: loop header
LB: loop body
LE: loop exit
PB: predicated region body
PF: predicated region fallthrough
CT: control target
= control target key end

     0   :  { %10 = vsyncpa [#allocation3], 0  ;;  %s3338_s0 = inlined_call_operand.hbm [shape: bf16[16,640], index: 0, kind: input, shape index: {}]   ;;  %s3339_s1 = inlined_call_operand.hbm [shape: bf16[1664,128], index: 1, kind: input, shape index: {}]   ;;  %s3340_s2 = inlined_call_operand.hbm [shape: bf16[128,512], index: 2, kind: input, shape index: {}]   ;;  %s3341_s3 = inlined_call_operand.hbm [shape: bf16[512,256], index: 3, kind: input, shape index: {}]   ;;  %s3342_s4 = inlined_call_operand.hbm [shape: f32[8,512], index: 4, kind: input, shape index: {}]   ;;  %s3343_s5 = inlined_call_operand.hbm [shape: f32[16,128], index: 5, kind: output, shape index: {}]  }
   0x1   :  { %11 = vsyncpa [#allocation6], 0 }
   0x2   :  { %12 = vsyncpa [#allocation9], 0  ;;  %s31_s20 = sshll.u32 %s3339_s1, 4  ;;  %s32_s20 = int_to_ptr.hbm [resolvable:$true] %s31_s20 }
   0x3   :  { %13 = vsyncpa [#allocation4], 0  ;;  %s3209_s21 = smov [#allocation5]   ;;  %s57_s25 = sshll.u32 %s3341_s3, 4  ;;  %s58_s25 = int_to_ptr.hbm [resolvable:$true] %s57_s25 }
   0x4   :  { %s33_s22 = sshll.u32 %s3209_s21, 4  ;;  %s3210_s26 = smov 64   ;;  %s34_s22 = int_to_ptr.vmem [resolvable:$true] %s33_s22 }
   0x5   :  { %s3211_s27 = smov 4   ;;  %s3212_s28 = smov [#allocation8]  }
   0x6   :  { %39 = dma.hbm_to_vmem [thread:$0]  %s32_s20, 13312, %s34_s22, [#allocation6], %s3210_s26, %s3210_s26, %s3211_s27  }
   0x7   :  { %s59_s29 = sshll.u32 %s3212_s28, 4  ;;  %s3213_s30 = smov 128   ;;  %s60_s29 = int_to_ptr.vmem [resolvable:$true] %s59_s29 }
   0x8   :  { %s3214_s6 = smov 8   ;;  %s18_s8 = sshll.u32 %s3338_s0, 4  ;;  %s19_s8 = int_to_ptr.hbm [resolvable:$true] %s18_s8 }
   0x9   :  { %65 = dma.hbm_to_vmem [thread:$0]  %s58_s25, 8192, %s60_s29, [#allocation9], %s3213_s30, %s3213_s30, %s3214_s6  }
   0xa   :  { %s3215_s9 = smov [#allocation2]   ;;  %s44_s12 = sshll.u32 %s3340_s2, 4  ;;  %s45_s12 = int_to_ptr.hbm [resolvable:$true] %s44_s12 }
   0xb   :  { %s20_s3 = sshll.u32 %s3215_s9, 4  ;;  %s3216_s13 = smov 320   ;;  %s21_s3 = int_to_ptr.vmem [resolvable:$true] %s20_s3 }
   0xc   :  { %s3217_s14 = smov 20   ;;  %s3218_s15 = smov [#allocation7]  }
   0xd   :  { %26 = dma.hbm_to_vmem [thread:$0]  %s19_s8, 640, %s21_s3, [#allocation3], %s3216_s13, %s3216_s13, %s3217_s14  }
   0xe   :  { %s46_s16 = sshll.u32 %s3218_s15, 4  ;;  %s3219_s17 = smov 256   ;;  %s47_s16 = int_to_ptr.vmem [resolvable:$true] %s46_s16 }
   0xf   :  { %s3220_s18 = smov 16   ;;  %s71_s20 = sshll.u32 %s3342_s4, 4  ;;  %s72_s20 = int_to_ptr.hbm [resolvable:$true] %s71_s20 }
  0x10   :  { %52 = dma.hbm_to_vmem [thread:$0]  %s45_s12, 4096, %s47_s16, [#allocation6], %s3219_s17, %s3219_s17, %s3220_s18  }
  0x11   :  { %s3221_s21 = smov [#allocation10]  }
  0x12   :  { %s73_s22 = sshll.u32 %s3221_s21, 4  ;;  %s74_s22 = int_to_ptr.vmem [resolvable:$true] %s73_s22 }
  0x13   :  { %76 = dma.hbm_to_vmem [thread:$0]  %s72_s20, 512, %s74_s22, [#allocation9]  }
  0x14   :  { %3201 = dma.done.wait [#allocation3], 640  }
  0x15   :  { %3202 = vsyncadd [#allocation3], 4294966656 }
  0x16   :  { %3203 = dma.done.wait [#allocation6], 17408  }
  0x17   :  { %3204 = vsyncadd [#allocation6], 4294949888 }
  0x18   :  { %3205 = dma.done.wait [#allocation9], 8704  }
  0x19   :  { %3206 = vsyncadd [#allocation9], 4294958592  ;;  %v2842_v0 = vld [vmem:[#allocation5 + $0x38] sm:$0xff]  ;;  %v2841_v4 = vld [vmem:[#allocation5 + $0x30] sm:$0xff]  ;;  %s3222_s2 = smov [#allocation11]   ;;  %s1993_s25 = sshll.u32 %s3343_s5, 4  ;;  %s1994_s25 = int_to_ptr.hbm [resolvable:$true] %s1993_s25 }
  0x1a   :  { %v2858_v1 = vld [vmem:[#allocation5 + $0xb8] sm:$0xff]  ;;  %449 = vmatpush.bf16.msra.mxu0 %v2842_v0  ;;  %v2857_v5 = vld [vmem:[#allocation5 + $0xb0] sm:$0xff]  ;;  %v2840_v8 = vld [vmem:[#allocation5 + $0x28] sm:$0xff]  ;;  %s1991_s4 = sshll.u32 %s3222_s2, 4  ;;  %s1992_s4 = int_to_ptr.vmem [resolvable:$true] %s1991_s4 }
  0x1b   :  { %v2866_v2 = vld [vmem:[#allocation5 + $0xf8] sm:$0xff]  ;;  %477 = vmatpush.bf16.msra.mxu2 %v2858_v1  ;;  %v2865_v6 = vld [vmem:[#allocation5 + $0xf0] sm:$0xff]  ;;  %v2856_v9 = vld [vmem:[#allocation5 + $0xa8] sm:$0xff] }
  0x1c   :  { %v2850_v3 = vld [vmem:[#allocation5 + $0x78] sm:$0xff]  ;;  %491 = vmatpush.bf16.msra.mxu3 %v2866_v2  ;;  %v2849_v7 = vld [vmem:[#allocation5 + $0x70] sm:$0xff]  ;;  %v2864_v10 = vld [vmem:[#allocation5 + $0xe8] sm:$0xff] }
  0x1d   :  { %463 = vmatpush.bf16.msra.mxu1 %v2850_v3  ;;  %v2848_v11 = vld [vmem:[#allocation5 + $0x68] sm:$0xff]  ;;  %v2839_v12 = vld [vmem:[#allocation5 + $0x20] sm:$0xff]  ;;  %v2838_v16 = vld [vmem:[#allocation5 + $0x18] sm:$0xff] }
  0x1e   :  { %450 = vmatpush.bf16.msra.mxu0 %v2841_v4  ;;  %v2855_v13 = vld [vmem:[#allocation5 + $0xa0] sm:$0xff]  ;;  %v2854_v17 = vld [vmem:[#allocation5 + $0x98] sm:$0xff]  ;;  %v2837_v20 = vld [vmem:[#allocation5 + $0x10] sm:$0xff] }
  0x1f   :  { %478 = vmatpush.bf16.msra.mxu2 %v2857_v5  ;;  %v2863_v14 = vld [vmem:[#allocation5 + $0xe0] sm:$0xff]  ;;  %v2862_v18 = vld [vmem:[#allocation5 + $0xd8] sm:$0xff]  ;;  %v2853_v21 = vld [vmem:[#allocation5 + $0x90] sm:$0xff] }
  0x20   :  { %492 = vmatpush.bf16.msra.mxu3 %v2865_v6  ;;  %v2847_v15 = vld [vmem:[#allocation5 + $0x60] sm:$0xff]  ;;  %v2846_v19 = vld [vmem:[#allocation5 + $0x58] sm:$0xff]  ;;  %v2861_v22 = vld [vmem:[#allocation5 + $0xd0] sm:$0xff] }
  0x21   :  { %464 = vmatpush.bf16.msra.mxu1 %v2849_v7  ;;  %v2845_v23 = vld [vmem:[#allocation5 + $0x50] sm:$0xff]  ;;  %v2836_v24 = vld [vmem:[#allocation5 + $0x8] sm:$0xff]  ;;  %v2835_v28 = vld [vmem:[#allocation5] sm:$0xff] }
  0x22   :  { %451 = vmatpush.bf16.msra.mxu0 %v2840_v8  ;;  %v2852_v25 = vld [vmem:[#allocation5 + $0x88] sm:$0xff]  ;;  %v2851_v29 = vld [vmem:[#allocation5 + $0x80] sm:$0xff]  ;;  %v2874_v30 = vld [vmem:[#allocation5 + $0x138] sm:$0xff] }
  0x23   :  { %479 = vmatpush.bf16.msra.mxu2 %v2856_v9  ;;  %v2860_v26 = vld [vmem:[#allocation5 + $0xc8] sm:$0xff]  ;;  %v2018_v31 = vld [vmem:[#allocation2 + $0x8] sm:$0xf]  ;;  %v2833_v32 = vld [vmem:[#allocation2 + $0x18] sm:$0xf0] }
  0x24   :  { %493 = vmatpush.bf16.msra.mxu3 %v2864_v10  ;;  %v2844_v27 = vld [vmem:[#allocation5 + $0x48] sm:$0xff]  ;;  %v2010_v33 = vld [vmem:[#allocation2] sm:$0xf]  ;;  %v2859_v35 = vld [vmem:[#allocation5 + $0xc0] sm:$0xff]  ;;  %v2019_v41 = vor.u32 %v2833_v32, %v2018_v31 }
  0x25   :  { %465 = vmatpush.bf16.msra.mxu1 %v2848_v11  ;;  %v2832_v34 = vld [vmem:[#allocation2 + $0x10] sm:$0xf0]  ;;  %v2831_v36 = vld [vmem:[#allocation2 + $0xc] sm:$0xf]  ;;  %v2020_v37 = vld [vmem:[#allocation2 + $0x1c] sm:$0xf0] }
  0x26   :  { %452 = vmatpush.bf16.msra.mxu0 %v2839_v12  ;;  %v2843_v38 = vld [vmem:[#allocation5 + $0x40] sm:$0xff]  ;;  %v2830_v39 = vld [vmem:[#allocation2 + $0x4] sm:$0xf]  ;;  %v2012_v40 = vld [vmem:[#allocation2 + $0x14] sm:$0xf0]  ;;  %v2011_v42 = vor.u32 %v2832_v34, %v2010_v33  ;;  %v2023_v43 = vor.u32 %v2831_v36, %v2020_v37 }
  0x27   :  { %480 = vmatpush.bf16.msra.mxu2 %v2855_v13  ;;  %v2873_v44 = vld [vmem:[#allocation5 + $0x130] sm:$0xff]  ;;  %v2015_v45 = vor.u32 %v2830_v39, %v2012_v40  ;;  %v2872_v46 = vld [vmem:[#allocation5 + $0x128] sm:$0xff]  ;;  %v2871_v47 = vld [vmem:[#allocation5 + $0x120] sm:$0xff] }
  0x28   :  { %494 = vmatpush.bf16.msra.mxu3 %v2863_v14  ;;  %v2870_v48 = vld [vmem:[#allocation5 + $0x118] sm:$0xff]  ;;  %v2869_v49 = vld [vmem:[#allocation5 + $0x110] sm:$0xff]  ;;  %v2868_v50 = vld [vmem:[#allocation5 + $0x108] sm:$0xff] }
  0x29   :  { %466 = vmatpush.bf16.msra.mxu1 %v2847_v15  ;;  %v2867_v51 = vld [vmem:[#allocation5 + $0x100] sm:$0xff]  ;;  %v2026_v52 = vld [vmem:[#allocation2 + $0x10] sm:$0xf]  ;;  %v2834_v53 = vld [vmem:[#allocation2 + $0x20] sm:$0xf0] }
  0x2a   :  { %453 = vmatpush.bf16.msra.mxu0 %v2838_v16  ;;  %v2027_v54 = vor.u32 %v2834_v53, %v2026_v52  ;;  %v2882_v55 = vld [vmem:[#allocation5 + $0x178] sm:$0xff]  ;;  %v2881_v56 = vld [vmem:[#allocation5 + $0x170] sm:$0xff]  ;;  %v2880_v57 = vld [vmem:[#allocation5 + $0x168] sm:$0xff] }
  0x2b   :  { %481 = vmatpush.bf16.msra.mxu2 %v2854_v17  ;;  %v2879_v58 = vld [vmem:[#allocation5 + $0x160] sm:$0xff]  ;;  %v2878_v59 = vld [vmem:[#allocation5 + $0x158] sm:$0xff]  ;;  %v2877_v60 = vld [vmem:[#allocation5 + $0x150] sm:$0xff] }
  0x2c   :  { %495 = vmatpush.bf16.msra.mxu3 %v2862_v18  ;;  %v2876_v61 = vld [vmem:[#allocation5 + $0x148] sm:$0xff]  ;;  %v2875_v62 = vld [vmem:[#allocation5 + $0x140] sm:$0xff]  ;;  %v2890_v63 = vld [vmem:[#allocation5 + $0x1b8] sm:$0xff] }
  0x2d   :  { %467 = vmatpush.bf16.msra.mxu1 %v2846_v19  ;;  %v2889_v1 = vld [vmem:[#allocation5 + $0x1b0] sm:$0xff]  ;;  %v2888_v3 = vld [vmem:[#allocation5 + $0x1a8] sm:$0xff]  ;;  %v2887_v5 = vld [vmem:[#allocation5 + $0x1a0] sm:$0xff] }
  0x2e   :  { %454 = vmatpush.bf16.msra.mxu0 %v2837_v20  ;;  %v2368_v34 = vld [vmem:[#allocation7 + $0xe0] sm:$0xf]  ;;  %v2919_v36 = vld [vmem:[#allocation7 + $0xe4] sm:$0xf]  ;;  %v2376_v39 = vld [vmem:[#allocation7 + $0xe8] sm:$0xf] }
  0x2f   :  { %482 = vmatpush.bf16.msra.mxu2 %v2853_v21  ;;  %v2922_v40 = vld [vmem:[#allocation7 + $0xf4] sm:$0xf0] }
  0x30   :  { %496 = vmatpush.bf16.msra.mxu3 %v2861_v22  ;;  %v2886_v22 = vld [vmem:[#allocation5 + $0x198] sm:$0xff] }
  0x31   :  { %468 = vmatpush.bf16.msra.mxu1 %v2845_v23  ;;  %v2885_v23 = vld [vmem:[#allocation5 + $0x190] sm:$0xff]  ;;  %v2918_v52 = vld [vmem:[#allocation7 + $0xd4] sm:$0xf0] }
  0x32   :  { %455 = vmatpush.bf16.msra.mxu0 %v2836_v24  ;;  %v2884_v24 = vld [vmem:[#allocation5 + $0x188] sm:$0xff] }
  0x33   :  { %483 = vmatpush.bf16.msra.mxu2 %v2852_v25  ;;  %v2883_v25 = vld [vmem:[#allocation5 + $0x180] sm:$0xff] }
  0x34   :  { %497 = vmatpush.bf16.msra.mxu3 %v2860_v26 }
  0x35   :  { %469 = vmatpush.bf16.msra.mxu1 %v2844_v27  ;;  %v536_v27 = vld [vmem:[#allocation10] ss:$0 sm:$0xff] }
  0x36   :  { %456 = vmatpush.bf16.msra.mxu0 %v2835_v28 }
  0x37   :  { %484 = vmatpush.bf16.msra.mxu2 %v2851_v29 }
  0x38   :  { %498 = vmatpush.bf16.msra.mxu3 %v2859_v35  ;;  %v2921_v35 = vld [vmem:[#allocation7 + $0xec] sm:$0xf0] }
  0x39   :  { %470 = vmatpush.bf16.msra.mxu1 %v2843_v38  ;;  %457 = vmatmul.bf16.vlgmr.msra.gmra.mxu0 %v2011_v42  ;;  %v2369_v37 = vor.u32 %v2921_v35, %v2368_v34  ;;  %v2370_v38 = vld [vmem:[#allocation7 + $0xf0] sm:$0xf0]  ;;  %v2377_v42 = vor.u32 %v2922_v40, %v2376_v39  ;;  %v2901_v34 = vld [vmem:[#allocation7 + $0x4c] sm:$0xf0]  ;;  %v2899_v35 = vld [vmem:[#allocation7 + $0x44] sm:$0xf] }
  0x3a   :  { %505 = vmatpush.bf16.msrb.mxu0 %v2874_v30  ;;  %485 = vmatmul.bf16.vlgmr.msra.gmra.mxu2 %v2019_v41  ;;  %v2373_v41 = vor.u32 %v2919_v36, %v2370_v38  ;;  %v2290_v38 = vld [vmem:[#allocation7 + $0x50] sm:$0xf0]  ;;  %v2296_v39 = vld [vmem:[#allocation7 + $0x48] sm:$0xf]  ;;  %v2902_v40 = vld [vmem:[#allocation7 + $0x54] sm:$0xf0] }
  0x3b   :  { %499 = vmatmul.bf16.vlgmr.msra.gmra.mxu3 %v2023_v43  ;;  %667 = vmatpush.bf16.msrb.mxu2 %v2890_v63  ;;  %v2920_v43 = vld [vmem:[#allocation7 + $0xec] sm:$0xf]  ;;  %v2344_v63 = vld [vmem:[#allocation7 + $0xa8] sm:$0xf] }
  0x3c   :  { %471 = vmatmul.bf16.vlgmr.msra.gmra.mxu1 %v2015_v45  ;;  %927 = vmatpush.bf16.msrb.mxu3 %v2369_v37 }
  0x3d   :  { %585 = vmatpush.bf16.msrb.mxu1 %v2882_v55  ;;  %v2916_v55 = vld [vmem:[#allocation7 + $0xcc] sm:$0xf] }
  0x3e   :  { %506 = vmatpush.bf16.msrb.mxu0 %v2873_v44  ;;  %v2378_v44 = vld [vmem:[#allocation7 + $0xf8] sm:$0xf0] }
  0x3f   :  { %668 = vmatpush.bf16.msrb.mxu2 %v2889_v1  ;;  %v2381_v45 = vor.u32 %v2920_v43, %v2378_v44  ;;  %v2297_v43 = vor.u32 %v2902_v40, %v2296_v39  ;;  %v2900_v44 = vld [vmem:[#allocation7 + $0x4c] sm:$0xf]  ;;  %v2938_v40 = vld [vmem:[#allocation8 + $0x74] sm:$0xf0] }
  0x41   :  { %586 = vmatpush.bf16.msrb.mxu1 %v2881_v56  ;;  %v2362_v56 = vld [vmem:[#allocation7 + $0xd8] sm:$0xf0] }
  0x42   :  { %507 = vmatpush.bf16.msrb.mxu0 %v2872_v46  ;;  %v2352_v46 = vld [vmem:[#allocation7 + $0xc0] sm:$0xf] }
  0x43   :  { %669 = vmatpush.bf16.msrb.mxu2 %v2888_v3  ;;  %v2912_v3 = vld [vmem:[#allocation7 + $0xac] sm:$0xf] }
  0x45   :  { %587 = vmatpush.bf16.msrb.mxu1 %v2880_v57  ;;  %v2365_v57 = vor.u32 %v2916_v55, %v2362_v56  ;;  %v2898_v55 = vld [vmem:[#allocation7 + $0x34] sm:$0xf0]  ;;  %v2896_v56 = vld [vmem:[#allocation7 + $0x2c] sm:$0xf] }
  0x46   :  { %508 = vmatpush.bf16.msrb.mxu0 %v2871_v47  ;;  %v2917_v47 = vld [vmem:[#allocation7 + $0xcc] sm:$0xf0] }
  0x47   :  { %670 = vmatpush.bf16.msrb.mxu2 %v2887_v5 }
  0x49   :  { %588 = vmatpush.bf16.msrb.mxu1 %v2879_v58  ;;  %v2336_v58 = vld [vmem:[#allocation7 + $0xa0] sm:$0xf] }
  0x4a   :  { %509 = vmatpush.bf16.msrb.mxu0 %v2870_v48  ;;  %v2915_v48 = vld [vmem:[#allocation7 + $0xc4] sm:$0xf] }
  0x4b   :  { %671 = vmatpush.bf16.msrb.mxu2 %v2886_v22  ;;  %v2903_v22 = vld [vmem:[#allocation7 + $0x64] sm:$0xf] }
  0x4d   :  { %589 = vmatpush.bf16.msrb.mxu1 %v2878_v59  ;;  %v2913_v59 = vld [vmem:[#allocation7 + $0xac] sm:$0xf0] }
  0x4e   :  { %510 = vmatpush.bf16.msrb.mxu0 %v2869_v49  ;;  %v2353_v49 = vor.u32 %v2917_v47, %v2352_v46 }
  0x4f   :  { %672 = vmatpush.bf16.msrb.mxu2 %v2885_v23 }
  0x50   :  { %928 = vmatpush.bf16.msrb.mxu3 %v2353_v49  ;;  %v2897_v49 = vld [vmem:[#allocation7 + $0x2c] sm:$0xf0] }
  0x51   :  { %590 = vmatpush.bf16.msrb.mxu1 %v2877_v60  ;;  %v2911_v60 = vld [vmem:[#allocation7 + $0xa4] sm:$0xf] }
  0x52   :  { %511 = vmatpush.bf16.msrb.mxu0 %v2868_v50  ;;  %v2354_v50 = vld [vmem:[#allocation7 + $0xd0] sm:$0xf0] }
  0x53   :  { %673 = vmatpush.bf16.msrb.mxu2 %v2884_v24  ;;  %v2357_v53 = vor.u32 %v2915_v48, %v2354_v50  ;;  %v2306_v24 = vld [vmem:[#allocation7 + $0x70] sm:$0xf0]  ;;  %v2272_v48 = vld [vmem:[#allocation7 + $0x20] sm:$0xf] }
  0x54   :  { %v2273_v50 = vor.u32 %v2897_v49, %v2272_v48 }
  0x55   :  { %591 = vmatpush.bf16.msrb.mxu1 %v2876_v61  ;;  %v2337_v61 = vor.u32 %v2913_v59, %v2336_v58 }
  0x56   :  { %512 = vmatpush.bf16.msrb.mxu0 %v2867_v51  ;;  %v2360_v51 = vld [vmem:[#allocation7 + $0xc8] sm:$0xf] }
  0x57   :  { %674 = vmatpush.bf16.msrb.mxu2 %v2883_v25  ;;  %929 = vmatpush.bf16.msrb.mxu3 %v2337_v61  ;;  %v2312_v25 = vld [vmem:[#allocation7 + $0x68] sm:$0xf]  ;;  %v2893_v61 = vld [vmem:[#allocation7 + $0xc] sm:$0xf0] }
  0x59   :  { %513 = vmatmul.bf16.vlgmr.msrb.gmra.mxu0 %v2027_v54  ;;  %592 = vmatpush.bf16.msrb.mxu1 %v2875_v62  ;;  %v2361_v54 = vor.u32 %v2918_v52, %v2360_v51  ;;  %v2338_v62 = vld [vmem:[#allocation7 + $0xb0] sm:$0xf0]  ;;  %v2895_v51 = vld [vmem:[#allocation7 + $0x24] sm:$0xf] }
  0x5a   :  { %941 = vmatpush.bf16.msra.mxu0 %v2373_v41  ;;  %v2341_v1 = vor.u32 %v2911_v60, %v2338_v62  ;;  %v2274_v52 = vld [vmem:[#allocation7 + $0x30] sm:$0xf0]  ;;  %v2256_v60 = vld [vmem:[#allocation7] sm:$0xf]  ;;  %v2891_v62 = vld [vmem:[#allocation7 + $0x4] sm:$0xf] }
  0x5b   :  { %969 = vmatpush.bf16.msra.mxu2 %v2381_v45  ;;  %v2298_v45 = vld [vmem:[#allocation7 + $0x58] sm:$0xf0] }
  0x5c   :  { %v2301_v46 = vor.u32 %v2900_v44, %v2298_v45  ;;  %v2608_v44 = vld [vmem:[#allocation8 + $0x1c0] sm:$0xf]  ;;  %v2552_v45 = vld [vmem:[#allocation8 + $0x150] sm:$0xf] }
  0x5d   :  { %955 = vmatpush.bf16.msra.mxu1 %v2377_v42  ;;  %v2293_v42 = vor.u32 %v2899_v35, %v2290_v38  ;;  %v2440_v38 = vld [vmem:[#allocation8 + $0x70] sm:$0xf] }
  0x5e   :  { %942 = vmatpush.bf16.msra.mxu0 %v2357_v53  ;;  %v2280_v53 = vld [vmem:[#allocation7 + $0x28] sm:$0xf]  ;;  %v2441_v48 = vor.u32 %v2938_v40, %v2440_v38  ;;  %v2408_v38 = vld [vmem:[#allocation8 + $0x30] sm:$0xf] }
  0x5f   :  { %970 = vmatpush.bf16.msra.mxu2 %v2365_v57  ;;  %v2282_v57 = vld [vmem:[#allocation7 + $0x38] sm:$0xf0]  ;;  %v2281_v58 = vor.u32 %v2898_v55, %v2280_v53  ;;  %v2432_v53 = vld [vmem:[#allocation8 + $0x60] sm:$0xf]  ;;  %v2936_v55 = vld [vmem:[#allocation8 + $0x64] sm:$0xf0] }
  0x60   :  { %v2285_v59 = vor.u32 %v2896_v56, %v2282_v57  ;;  %v2480_v56 = vld [vmem:[#allocation8 + $0xc0] sm:$0xf]  ;;  %v2948_v57 = vld [vmem:[#allocation8 + $0xc4] sm:$0xf0] }
  0x61   :  { %956 = vmatpush.bf16.msra.mxu1 %v2361_v54  ;;  %v2277_v54 = vor.u32 %v2895_v51, %v2274_v52 }
  0x62   :  { %943 = vmatpush.bf16.msra.mxu0 %v2341_v1  ;;  %v2264_v1 = vld [vmem:[#allocation7 + $0x8] sm:$0xf] }
  0xb6   :  { %v458_v0 = vpop.f32.mrf.mxu0 }
  0xb9   :  { %v472_v2 = vpop.f32.mrf.mxu1 }
  0xba   :  { %v473_v9 = vadd.f32 %v472_v2, %v458_v0  ;;  %v2914_v0 = vld [vmem:[#allocation7 + $0xb4] sm:$0xf0] }
  0xbb   :  { %v2345_v2 = vor.u32 %v2914_v0, %v2344_v63  ;;  %v2257_v63 = vor.u32 %v2893_v61, %v2256_v60  ;;  %v2258_v0 = vld [vmem:[#allocation7 + $0x10] sm:$0xf0]  ;;  %v2433_v60 = vor.u32 %v2936_v55, %v2432_v53  ;;  %v2544_v61 = vld [vmem:[#allocation8 + $0x140] sm:$0xf] }
  0xbc   :  { %v2576_v55 = vld [vmem:[#allocation8 + $0x180] sm:$0xf] }
  0xbd   :  { %v486_v4 = vpop.f32.mrf.mxu2  ;;  %957 = vmatpush.bf16.msra.mxu1 %v2345_v2  ;;  %v2894_v2 = vld [vmem:[#allocation7 + $0x14] sm:$0xf0] }
  0xbe   :  { %v460_v6 = vpop.f32.mrf.mxu0  ;;  %v500_v7 = vpop.f32.mrf.mxu3  ;;  %v487_v13 = vadd.f32 %v486_v4, %v473_v9  ;;  %v2346_v4 = vld [vmem:[#allocation7 + $0xb8] sm:$0xf0] }
  0xbf   :  { %v2349_v5 = vor.u32 %v2912_v3, %v2346_v4  ;;  %v2261_v4 = vor.u32 %v2891_v62, %v2258_v0  ;;  %v2964_v62 = vld [vmem:[#allocation8 + $0x144] sm:$0xf0]  ;;  %v2978_v0 = vld [vmem:[#allocation8 + $0x1b4] sm:$0xf0] }
  0xc0   :  { %v501_v16 = vadd.f32 %v500_v7, %v487_v13  ;;  %v2909_v7 = vld [vmem:[#allocation7 + $0x8c] sm:$0xf0] }
  0xc1   :  { %v474_v8 = vpop.f32.mrf.mxu1  ;;  %971 = vmatpush.bf16.msra.mxu2 %v2349_v5  ;;  %v2265_v5 = vor.u32 %v2894_v2, %v2264_v1  ;;  %v2481_v1 = vor.u32 %v2948_v57, %v2480_v56  ;;  %v2424_v2 = vld [vmem:[#allocation8 + $0x50] sm:$0xf]  ;;  %v2972_v56 = vld [vmem:[#allocation8 + $0x184] sm:$0xf0] }
  0xc2   :  { %v475_v10 = vadd.f32 %v474_v8, %v460_v6  ;;  %v2320_v6 = vld [vmem:[#allocation7 + $0x80] sm:$0xf]  ;;  %v2907_v8 = vld [vmem:[#allocation7 + $0x84] sm:$0xf] }
  0xc3   :  { %v2321_v9 = vor.u32 %v2909_v7, %v2320_v6  ;;  %v2892_v6 = vld [vmem:[#allocation7 + $0xc] sm:$0xf]  ;;  %v2266_v7 = vld [vmem:[#allocation7 + $0x18] sm:$0xf0] }
  0xc5   :  { %v488_v11 = vpop.f32.mrf.mxu2  ;;  %930 = vmatpush.bf16.msrb.mxu3 %v2321_v9  ;;  %v2269_v9 = vor.u32 %v2892_v6, %v2266_v7  ;;  %v2545_v6 = vor.u32 %v2964_v62, %v2544_v61  ;;  %v2472_v7 = vld [vmem:[#allocation8 + $0xb0] sm:$0xf]  ;;  %v2928_v61 = vld [vmem:[#allocation8 + $0x24] sm:$0xf0] }
  0xc6   :  { %v489_v14 = vadd.f32 %v488_v11, %v475_v10  ;;  %v502_v15 = vpop.f32.mrf.mxu3  ;;  %v2322_v10 = vld [vmem:[#allocation7 + $0x90] sm:$0xf0]  ;;  %v2328_v11 = vld [vmem:[#allocation7 + $0x88] sm:$0xf] }
  0xc7   :  { %v2325_v13 = vor.u32 %v2907_v8, %v2322_v10 }
  0xc8   :  { %v503_v17 = vadd.f32 %v502_v15, %v489_v14  ;;  %v2908_v15 = vld [vmem:[#allocation7 + $0x8c] sm:$0xf] }
  0xc9   :  { %944 = vmatpush.bf16.msra.mxu0 %v2325_v13  ;;  %v2632_v13 = vld [vmem:[#allocation8 + $0x1f0] sm:$0xf] }
  0xd6   :  { %v514_v12 = vpop.f32.mrf.mxu0 }
  0xd7   :  { %v3271_v19 = vadd.f32 %v514_v12, %v501_v16  ;;  %v2910_v12 = vld [vmem:[#allocation7 + $0x94] sm:$0xf0]  ;;  %v2330_v16 = vld [vmem:[#allocation7 + $0x98] sm:$0xf0] }
  0xd8   :  { %v2329_v14 = vor.u32 %v2910_v12, %v2328_v11 }
  0xda   :  { %958 = vmatpush.bf16.msra.mxu1 %v2329_v14  ;;  %v2986_v14 = vld [vmem:[#allocation8 + $0x1f4] sm:$0xf0] }
  0xde   :  { %v516_v18 = vpop.f32.mrf.mxu0 }
  0xdf   :  { %v3273_v20 = vadd.f32 %v516_v18, %v503_v17  ;;  %v2333_v17 = vor.u32 %v2908_v15, %v2330_v16  ;;  %v2304_v18 = vld [vmem:[#allocation7 + $0x60] sm:$0xf]  ;;  %v2984_v16 = vld [vmem:[#allocation8 + $0x1e4] sm:$0xf0] }
  0xe0   :  { %v2624_v15 = vld [vmem:[#allocation8 + $0x1e0] sm:$0xf] }
  0xe1   :  { %v519_v21 = vpack.c.bf16 %v3273_v20, %v3271_v19  ;;  %972 = vmatpush.bf16.msra.mxu2 %v2333_v17  ;;  %v2633_v17 = vor.u32 %v2986_v14, %v2632_v13  ;;  %v2962_v13 = vld [vmem:[#allocation8 + $0x134] sm:$0xf0]  ;;  %v2506_v14 = vld [vmem:[#allocation8 + $0xf8] sm:$0xf0] }
  0xe3   :  { %593 = vmatmul.bf16.vlgmr.msrb.gmra.mxu1 %v519_v21  ;;  %v2905_v21 = vld [vmem:[#allocation7 + $0x6c] sm:$0xf0] }
  0xe4   :  { %v2305_v23 = vor.u32 %v2905_v21, %v2304_v18  ;;  %v2504_v18 = vld [vmem:[#allocation8 + $0xf0] sm:$0xf]  ;;  %v2954_v21 = vld [vmem:[#allocation8 + $0xf4] sm:$0xf0] }
  0xe6   :  { %931 = vmatpush.bf16.msrb.mxu3 %v2305_v23  ;;  %v2568_v23 = vld [vmem:[#allocation8 + $0x170] sm:$0xf] }
 0x160   :  { %v594_v26 = vpop.f32.mrf.mxu1 }
 0x161   :  { %v595_v28 = vadd.f32 %v594_v26, %v536_v27  ;;  %v2906_v26 = vld [vmem:[#allocation7 + $0x74] sm:$0xf0] }
 0x163   :  { %v599_v31 = vmax.f32 %v595_v28, 0.0  ;;  %v2313_v28 = vor.u32 %v2906_v26, %v2312_v25  ;;  %v2625_v25 = vor.u32 %v2984_v16, %v2624_v15  ;;  %v2416_v16 = vld [vmem:[#allocation8 + $0x40] sm:$0xf] }
 0x165   :  { %959 = vmatpush.bf16.msra.mxu1 %v2313_v28  ;;  %v2496_v28 = vld [vmem:[#allocation8 + $0xe0] sm:$0xf] }
 0x168   :  { %v596_v29 = vpop.f32.mrf.mxu1 }
 0x169   :  { %v597_v30 = vadd.f32 %v596_v29, %v536_v27  ;;  %v2309_v27 = vor.u32 %v2903_v22, %v2306_v24  ;;  %v2904_v29 = vld [vmem:[#allocation7 + $0x6c] sm:$0xf]  ;;  %960 = vmatpush.bf16.msra.mxu1 %v2297_v43  ;;  %v2505_v22 = vor.u32 %v2954_v21, %v2504_v18  ;;  %v2970_v24 = vld [vmem:[#allocation8 + $0x174] sm:$0xf0] }
 0x16a   :  { %v2569_v26 = vor.u32 %v2970_v24, %v2568_v23  ;;  %v2976_v23 = vld [vmem:[#allocation8 + $0x1a4] sm:$0xf0]  ;;  %v2926_v18 = vld [vmem:[#allocation8 + $0x14] sm:$0xf0] }
 0x16b   :  { %v600_v32 = vmax.f32 %v597_v30, 0.0  ;;  %v2314_v30 = vld [vmem:[#allocation7 + $0x78] sm:$0xf0]  ;;  %945 = vmatpush.bf16.msra.mxu0 %v2309_v27  ;;  %v2616_v27 = vld [vmem:[#allocation8 + $0x1d0] sm:$0xf] }
 0x16d   :  { %v601_v33 = vpack.c.bf16 %v600_v32, %v599_v31  ;;  %v618_v31 = vld [vmem:[#allocation10 + $0x1] ss:$0 sm:$0xff]  ;;  %v2317_v32 = vor.u32 %v2904_v29, %v2314_v30  ;;  %961 = vmatpush.bf16.msra.mxu1 %v2281_v58  ;;  %v2952_v29 = vld [vmem:[#allocation8 + $0xe4] sm:$0xf0] }
 0x16f   :  { %675 = vmatmul.bf16.vlgmr.msrb.gmra.mxu2 %v601_v33  ;;  %v2288_v33 = vld [vmem:[#allocation7 + $0x40] sm:$0xf]  ;;  %946 = vmatpush.bf16.msra.mxu0 %v2293_v42  ;;  %v2950_v42 = vld [vmem:[#allocation8 + $0xd4] sm:$0xf0] }
 0x170   :  { %973 = vmatpush.bf16.msra.mxu2 %v2317_v32  ;;  %v2289_v37 = vor.u32 %v2901_v34, %v2288_v33  ;;  %v2497_v32 = vor.u32 %v2952_v29, %v2496_v28  ;;  %v2560_v33 = vld [vmem:[#allocation8 + $0x160] sm:$0xf]  ;;  %v2968_v34 = vld [vmem:[#allocation8 + $0x164] sm:$0xf0] }
 0x171   :  { %962 = vmatpush.bf16.msra.mxu1 %v2265_v5  ;;  %v2464_v28 = vld [vmem:[#allocation8 + $0xa0] sm:$0xf]  ;;  %v2944_v29 = vld [vmem:[#allocation8 + $0xa4] sm:$0xf0] }
 0x172   :  { %932 = vmatpush.bf16.msrb.mxu3 %v2289_v37  ;;  %v2561_v37 = vor.u32 %v2968_v34, %v2560_v33  ;;  %v2528_v33 = vld [vmem:[#allocation8 + $0x120] sm:$0xf]  ;;  %v2960_v34 = vld [vmem:[#allocation8 + $0x124] sm:$0xf0] }
 0x173   :  { %947 = vmatpush.bf16.msra.mxu0 %v2277_v54 }
 0x174   :  { %974 = vmatpush.bf16.msra.mxu2 %v2301_v46 }
 0x175   :  { %1414 = vmatpush.bf16.msrb.mxu1 %v2569_v26 }
 0x176   :  { %933 = vmatpush.bf16.msrb.mxu3 %v2273_v50  ;;  %v2966_v50 = vld [vmem:[#allocation8 + $0x154] sm:$0xf0] }
 0x177   :  { %948 = vmatpush.bf16.msra.mxu0 %v2261_v4  ;;  %v2553_v52 = vor.u32 %v2966_v50, %v2552_v45  ;;  %v2529_v45 = vor.u32 %v2960_v34, %v2528_v33 }
 0x178   :  { %975 = vmatpush.bf16.msra.mxu2 %v2285_v59  ;;  %v2600_v59 = vld [vmem:[#allocation8 + $0x1b0] sm:$0xf] }
 0x179   :  { %1415 = vmatpush.bf16.msrb.mxu1 %v2561_v37  ;;  %v2601_v15 = vor.u32 %v2978_v0, %v2600_v59  ;;  %v2634_v0 = vld [vmem:[#allocation8 + $0x1f8] sm:$0xf0] }
 0x17a   :  { %934 = vmatpush.bf16.msrb.mxu3 %v2257_v63 }
 0x17b   :  { %1400 = vmatpush.bf16.msrb.mxu0 %v2505_v22  ;;  %v2592_v22 = vld [vmem:[#allocation8 + $0x1a0] sm:$0xf] }
 0x17c   :  { %976 = vmatpush.bf16.msra.mxu2 %v2269_v9  ;;  %v2593_v37 = vor.u32 %v2976_v23, %v2592_v22  ;;  %v2981_v23 = vld [vmem:[#allocation8 + $0x1d4] sm:$0xf] }
 0x17d   :  { %1416 = vmatpush.bf16.msrb.mxu1 %v2553_v52 }
 0x17e   :  { %1386 = vmatpush.bf16.msra.mxu3 %v2441_v48 }
 0x17f   :  { %1401 = vmatpush.bf16.msrb.mxu0 %v2497_v32 }
 0x180   :  { %1428 = vmatpush.bf16.msrb.mxu2 %v2633_v17  ;;  %v2932_v17 = vld [vmem:[#allocation8 + $0x44] sm:$0xf0] }
 0x181   :  { %1417 = vmatpush.bf16.msrb.mxu1 %v2545_v6  ;;  %v2417_v32 = vor.u32 %v2932_v17, %v2416_v16  ;;  %v2577_v6 = vor.u32 %v2972_v56, %v2576_v55  ;;  %v2570_v17 = vld [vmem:[#allocation8 + $0x178] sm:$0xf0]  ;;  %v2963_v55 = vld [vmem:[#allocation8 + $0x144] sm:$0xf] }
 0x182   :  { %1387 = vmatpush.bf16.msra.mxu3 %v2433_v60  ;;  %v2400_v60 = vld [vmem:[#allocation8 + $0x20] sm:$0xf] }
 0x184   :  { %1429 = vmatpush.bf16.msrb.mxu2 %v2625_v25 }
 0x1f2   :  { %v676_v36 = vpop.f32.mrf.mxu2 }
 0x1f3   :  { %v677_v41 = vadd.f32 %v676_v36, %v618_v31 }
 0x1f5   :  { %v2252_v47 = vmul.f32 -1.442695, %v677_v41  ;;  %v2488_v41 = vld [vmem:[#allocation8 + $0xd0] sm:$0xf] }
 0x1f6   :  { %v2489_v49 = vor.u32 %v2950_v42, %v2488_v41  ;;  %v2584_v41 = vld [vmem:[#allocation8 + $0x190] sm:$0xf]  ;;  %v2974_v42 = vld [vmem:[#allocation8 + $0x194] sm:$0xf0] }
 0x1f7   :  { %3049 = vpow2.f32 %v2252_v47  ;;  %v2980_v47 = vld [vmem:[#allocation8 + $0x1c4] sm:$0xf0]  ;;  %v2585_v53 = vor.u32 %v2974_v42, %v2584_v41  ;;  %v2949_v42 = vld [vmem:[#allocation8 + $0xd4] sm:$0xf] }
 0x1f8   :  { %v2609_v58 = vor.u32 %v2980_v47, %v2608_v44  ;;  %1402 = vmatpush.bf16.msrb.mxu0 %v2489_v49  ;;  %v2942_v47 = vld [vmem:[#allocation8 + $0x94] sm:$0xf0] }
 0x1fa   :  { %v678_v3 = vpop.f32.mrf.mxu2 }
 0x1fb   :  { %v679_v8 = vadd.f32 %v678_v3, %v618_v31  ;;  %v2982_v31 = vld [vmem:[#allocation8 + $0x1d4] sm:$0xf0] }
 0x1fc   :  { %v2617_v43 = vor.u32 %v2982_v31, %v2616_v27  ;;  %v2934_v3 = vld [vmem:[#allocation8 + $0x54] sm:$0xf0]  ;;  %1403 = vmatpush.bf16.msrb.mxu0 %v2481_v1  ;;  %v2448_v1 = vld [vmem:[#allocation8 + $0x80] sm:$0xf] }
 0x1fd   :  { %v3050_v10 = vpop.eup %3049  ;;  %v2253_v11 = vmul.f32 -1.442695, %v679_v8  ;;  %v2946_v8 = vld [vmem:[#allocation8 + $0xb4] sm:$0xf0] }
 0x1fe   :  { %v3277_v12 = vadd.f32 1.0, %v3050_v10  ;;  %1430 = vmatpush.bf16.msrb.mxu2 %v2617_v43  ;;  %v2425_v10 = vor.u32 %v2934_v3, %v2424_v2  ;;  %v2473_v24 = vor.u32 %v2946_v8, %v2472_v7  ;;  %v2465_v43 = vor.u32 %v2944_v29, %v2464_v28  ;;  %v2940_v2 = vld [vmem:[#allocation8 + $0x84] sm:$0xf0]  ;;  %v2512_v3 = vld [vmem:[#allocation8 + $0x100] sm:$0xf] }
 0x1ff   :  { %3051 = vpow2.f32 %v2253_v11  ;;  %v2536_v11 = vld [vmem:[#allocation8 + $0x130] sm:$0xf]  ;;  %v2401_v7 = vor.u32 %v2928_v61, %v2400_v60  ;;  %v2967_v28 = vld [vmem:[#allocation8 + $0x164] sm:$0xf] }
 0x200   :  { %3053 = vrcp.f32 %v3277_v12  ;;  %v698_v51 = vand.u32 2147483647, %v3277_v12  ;;  %v700_v5 = vand.u32 2147483648, %v3277_v12  ;;  %vm694_vm1 = vweird.f32 %v3277_v12  ;;  %1388 = vmatpush.bf16.msra.mxu3 %v2425_v10  ;;  %1404 = vmatpush.bf16.msrb.mxu0 %v2473_v24  ;;  %v2618_v24 = vld [vmem:[#allocation8 + $0x1d8] sm:$0xf0] }
 0x201   :  { %v2537_v27 = vor.u32 %v2962_v13, %v2536_v11  ;;  %v2953_v13 = vld [vmem:[#allocation8 + $0xf4] sm:$0xf] }
 0x202   :  { %1431 = vmatpush.bf16.msrb.mxu2 %v2609_v58  ;;  %vm3306_vm3 = vcmp.eq.f32.partialorder %v698_v51, 8.507059e+37  ;;  %v701_v25 = vor.u32 1.1754944e-38, %v700_v5  ;;  %v2958_v51 = vld [vmem:[#allocation8 + $0x114] sm:$0xf0]  ;;  %v2985_v58 = vld [vmem:[#allocation8 + $0x1f4] sm:$0xf]  ;;  %v2509_v16 = vor.u32 %v2953_v13, %v2506_v14 }
 0x203   :  { %1418 = vmatpush.bf16.msrb.mxu1 %v2537_v27  ;;  %v2637_v8 = vor.u32 %v2985_v58, %v2634_v0  ;;  %v2498_v27 = vld [vmem:[#allocation8 + $0xe8] sm:$0xf0]  ;;  %v2975_v58 = vld [vmem:[#allocation8 + $0x1a4] sm:$0xf] }
 0x204   :  { %1389 = vmatpush.bf16.msra.mxu3 %v2417_v32  ;;  %1405 = vmatpush.bf16.msrb.mxu0 %v2465_v43  ;;  %v2924_v32 = vld [vmem:[#allocation8 + $0x4] sm:$0xf0]  ;;  %v2490_v43 = vld [vmem:[#allocation8 + $0xd8] sm:$0xf0]  ;;  %v2943_v13 = vld [vmem:[#allocation8 + $0xa4] sm:$0xf] }
 0x205   :  { %v3052_v30 = vpop.eup %3051  ;;  %v2466_v14 = vld [vmem:[#allocation8 + $0xa8] sm:$0xf0] }
 0x206   :  { %v3280_v35 = vpop.eup %3053  ;;  %v3282_v36 = vadd.f32 1.0, %v3052_v30  ;;  %1432 = vmatpush.bf16.msrb.mxu2 %v2601_v15  ;;  %v2969_v15 = vld [vmem:[#allocation8 + $0x174] sm:$0xf] }
 0x207   :  { %v690_v39 = vmul.f32 %v3280_v35, %v3277_v12  ;;  %vm695_vm0 = vweird.f32 %v3280_v35  ;;  %1419 = vmatpush.bf16.msrb.mxu1 %v2529_v45  ;;  %v2965_v45 = vld [vmem:[#allocation8 + $0x154] sm:$0xf] }
 0x208   :  { %3055 = vrcp.f32 %v3282_v36  ;;  %vm3299_vm2 = vmor %vm694_vm1, %vm695_vm0  ;;  %v715_v26 = vand.u32 2147483648, %v3282_v36  ;;  %v713_v31 = vand.u32 2147483647, %v3282_v36  ;;  %vm709_vm5 = vweird.f32 %v3282_v36 }
 0x209   :  { %v691_v46 = vsub.f32 1.0, %v690_v39  ;;  %v2930_v39 = vld [vmem:[#allocation8 + $0x34] sm:$0xf0] }
 0x20a   :  { %v716_v44 = vor.u32 1.1754944e-38, %v715_v26  ;;  %vm714_vm7 = vcmp.eq.f32.partialorder %v713_v31, 8.507059e+37  ;;  %v2409_v50 = vor.u32 %v2930_v39, %v2408_v38  ;;  %1433 = vmatpush.bf16.msrb.mxu2 %v2593_v37  ;;  %v2951_v26 = vld [vmem:[#allocation8 + $0xe4] sm:$0xf]  ;;  %v2384_v31 = vld [vmem:[#allocation8] sm:$0xf] }
 0x20b   :  { %v692_v54 = vmul.f32 %v3280_v35, %v691_v46  ;;  %v2456_v46 = vld [vmem:[#allocation8 + $0x90] sm:$0xf]  ;;  %v2501_v29 = vor.u32 %v2951_v26, %v2498_v27  ;;  %v2385_v34 = vor.u32 %v2924_v32, %v2384_v31  ;;  %v2610_v37 = vld [vmem:[#allocation8 + $0x1c8] sm:$0xf0]  ;;  %v2937_v39 = vld [vmem:[#allocation8 + $0x74] sm:$0xf] }
 0x20c   :  { %v2457_v57 = vor.u32 %v2942_v47, %v2456_v46  ;;  %1390 = vmatpush.bf16.msra.mxu3 %v2409_v50  ;;  %v2554_v46 = vld [vmem:[#allocation8 + $0x158] sm:$0xf0]  ;;  %v2977_v47 = vld [vmem:[#allocation8 + $0x1b4] sm:$0xf]  ;;  %v2935_v50 = vld [vmem:[#allocation8 + $0x64] sm:$0xf] }
 0x20d   :  { %v693_v63 = vadd.f32 %v3280_v35, %v692_v54  ;;  %v2941_v26 = vld [vmem:[#allocation8 + $0x94] sm:$0xf]  ;;  %v2458_v27 = vld [vmem:[#allocation8 + $0x98] sm:$0xf0]  ;;  %v2927_v31 = vld [vmem:[#allocation8 + $0x24] sm:$0xf] }
 0x20e   :  { %v3291_v4 = vpop.eup %3055  ;;  %1434 = vmatpush.bf16.msrb.mxu2 %v2585_v53  ;;  %1406 = vmatpush.bf16.msrb.mxu0 %v2457_v57  ;;  %v2947_v53 = vld [vmem:[#allocation8 + $0xc4] sm:$0xf]  ;;  %v2546_v57 = vld [vmem:[#allocation8 + $0x148] sm:$0xf0] }
 0x20f   :  { %v705_v9 = vmul.f32 %v3291_v4, %v3282_v36  ;;  %v697_v12 = vsel %vm3299_vm2, %v3280_v35, %v693_v63  ;;  %vm710_vm4 = vweird.f32 %v3291_v4  ;;  %v2520_v36 = vld [vmem:[#allocation8 + $0x110] sm:$0xf]  ;;  %v2549_v60 = vor.u32 %v2963_v55, %v2546_v57  ;;  %v2402_v32 = vld [vmem:[#allocation8 + $0x28] sm:$0xf0] }
 0x210   :  { %v702_v35 = vsel %vm3306_vm3, %v701_v25, %v697_v12  ;;  %vm711_vm6 = vmor %vm709_vm5, %vm710_vm4  ;;  %v2521_v59 = vor.u32 %v2958_v51, %v2520_v36  ;;  %1391 = vmatpush.bf16.msra.mxu3 %v2401_v7  ;;  %v2392_v12 = vld [vmem:[#allocation8 + $0x10] sm:$0xf]  ;;  %v2621_v25 = vor.u32 %v2981_v23, %v2618_v24  ;;  %v2434_v36 = vld [vmem:[#allocation8 + $0x68] sm:$0xf0] }
 0x211   :  { %v706_v21 = vsub.f32 1.0, %v705_v9  ;;  %v719_v49 = vmul.f32 %v702_v35, %v3271_v19  ;;  %v2449_v9 = vor.u32 %v2940_v2, %v2448_v1  ;;  %v2393_v22 = vor.u32 %v2926_v18, %v2392_v12  ;;  %v2979_v35 = vld [vmem:[#allocation8 + $0x1c4] sm:$0xf]  ;;  %v2945_v1 = vld [vmem:[#allocation8 + $0xb4] sm:$0xf] }
 0x212   :  { %1420 = vmatpush.bf16.msrb.mxu1 %v2521_v59  ;;  %1435 = vmatpush.bf16.msrb.mxu2 %v2577_v6  ;;  %v2613_v38 = vor.u32 %v2979_v35, %v2610_v37  ;;  %v2594_v59 = vld [vmem:[#allocation8 + $0x1a8] sm:$0xf0]  ;;  %v2474_v2 = vld [vmem:[#allocation8 + $0xb8] sm:$0xf0]  ;;  %v2973_v7 = vld [vmem:[#allocation8 + $0x194] sm:$0xf] }
 0x213   :  { %v707_v30 = vmul.f32 %v3291_v4, %v706_v21  ;;  %v721_v62 = vadd.f32 %v719_v49, %v3271_v19  ;;  %v2983_v19 = vld [vmem:[#allocation8 + $0x1e4] sm:$0xf]  ;;  %1407 = vmatpush.bf16.msrb.mxu0 %v2449_v9  ;;  %v2573_v21 = vor.u32 %v2969_v15, %v2570_v17  ;;  %v2602_v49 = vld [vmem:[#allocation8 + $0x1b8] sm:$0xf0]  ;;  %v2597_v61 = vor.u32 %v2975_v58, %v2594_v59  ;;  %v2530_v17 = vld [vmem:[#allocation8 + $0x128] sm:$0xf0] }
 0x214   :  { %1392 = vmatpush.bf16.msra.mxu3 %v2393_v22  ;;  %v2605_v51 = vor.u32 %v2977_v47, %v2602_v49  ;;  %v2538_v6 = vld [vmem:[#allocation8 + $0x138] sm:$0xf0]  ;;  %v2959_v15 = vld [vmem:[#allocation8 + $0x124] sm:$0xf]  ;;  %v2578_v18 = vld [vmem:[#allocation8 + $0x188] sm:$0xf0] }
 0x215   :  { %v708_v40 = vadd.f32 %v3291_v4, %v707_v30  ;;  %v2562_v30 = vld [vmem:[#allocation8 + $0x168] sm:$0xf0]  ;;  %v2971_v12 = vld [vmem:[#allocation8 + $0x184] sm:$0xf]  ;;  %v2929_v23 = vld [vmem:[#allocation8 + $0x34] sm:$0xf] }
 0x216   :  { %v2565_v33 = vor.u32 %v2967_v28, %v2562_v30  ;;  %v2581_v22 = vor.u32 %v2971_v12, %v2578_v18  ;;  %v2410_v24 = vld [vmem:[#allocation8 + $0x38] sm:$0xf0]  ;;  %v2957_v28 = vld [vmem:[#allocation8 + $0x114] sm:$0xf]  ;;  %v2939_v35 = vld [vmem:[#allocation8 + $0x84] sm:$0xf] }
 0x217   :  { %v712_v48 = vsel %vm711_vm6, %v3291_v4, %v708_v40  ;;  %v2956_v4 = vld [vmem:[#allocation8 + $0x104] sm:$0xf0]  ;;  %v2442_v40 = vld [vmem:[#allocation8 + $0x78] sm:$0xf0]  ;;  %v2450_v37 = vld [vmem:[#allocation8 + $0x88] sm:$0xf0] }
 0x218   :  { %v717_v52 = vsel %vm714_vm7, %v716_v44, %v712_v48  ;;  %v2513_v10 = vor.u32 %v2956_v4, %v2512_v3  ;;  %1393 = vmatpush.bf16.msra.mxu3 %v2385_v34  ;;  %v2445_v41 = vor.u32 %v2937_v39, %v2442_v40  ;;  %v2493_v44 = vor.u32 %v2949_v42, %v2490_v43  ;;  %v2961_v3 = vld [vmem:[#allocation8 + $0x134] sm:$0xf]  ;;  %v2522_v30 = vld [vmem:[#allocation8 + $0x118] sm:$0xf0]  ;;  %v2514_v40 = vld [vmem:[#allocation8 + $0x108] sm:$0xf0] }
 0x219   :  { %v720_v54 = vmul.f32 %v717_v52, %v3273_v20  ;;  %v2557_v48 = vor.u32 %v2965_v45, %v2554_v46  ;;  %v2437_v52 = vor.u32 %v2935_v50, %v2434_v36  ;;  %v2477_v4 = vor.u32 %v2945_v1, %v2474_v2  ;;  %v2394_v42 = vld [vmem:[#allocation8 + $0x18] sm:$0xf0]  ;;  %v757_v45 = vld [vmem:[#allocation10 + $0x2] ss:$8 sm:$0xf] }
 0x21a   :  { %1421 = vmatpush.bf16.msrb.mxu1 %v2513_v10  ;;  %v2541_v9 = vor.u32 %v2961_v3, %v2538_v6  ;;  %v2418_v10 = vld [vmem:[#allocation8 + $0x48] sm:$0xf0]  ;;  %v2405_v34 = vor.u32 %v2927_v31, %v2402_v32  ;;  %v2453_v39 = vor.u32 %v2939_v35, %v2450_v37  ;;  %v2923_v47 = vld [vmem:[#allocation8 + $0x4] sm:$0xf]  ;;  %v760_v36 = vperm.slane %v757_v45, 1  ;;  %v2989_v31 = vld [vmem:[#allocation5 + $0x1d0] sm:$0xff] }
 0x21b   :  { %v722_v63 = vadd.f32 %v720_v54, %v3273_v20  ;;  %v2626_v20 = vld [vmem:[#allocation8 + $0x1e8] sm:$0xf0]  ;;  %v759_v57 = vperm.slane %v757_v45, 0  ;;  %v3007_v18 = vld [vmem:[#allocation5 + $0x260] sm:$0xff]  ;;  %v3001_v32 = vld [vmem:[#allocation5 + $0x230] sm:$0xff] }
 0x21c   :  { %v2629_v11 = vor.u32 %v2983_v19, %v2626_v20  ;;  %v2482_v54 = vld [vmem:[#allocation8 + $0xc8] sm:$0xf0]  ;;  %v2931_v20 = vld [vmem:[#allocation8 + $0x44] sm:$0xf]  ;;  %v2998_v37 = vld [vmem:[#allocation5 + $0x218] sm:$0xff] }
 0x21d   :  { %v3325_v5 = vpack.c.bf16 %v722_v63, %v721_v62  ;;  %v2485_v56 = vor.u32 %v2947_v53, %v2482_v54  ;;  %v2933_v62 = vld [vmem:[#allocation8 + $0x54] sm:$0xf]  ;;  %v2426_v63 = vld [vmem:[#allocation8 + $0x58] sm:$0xf0]  ;;  %v3008_v12 = vld [vmem:[#allocation5 + $0x268] sm:$0xff] }
 0x21e   :  { %v2429_v0 = vor.u32 %v2933_v62, %v2426_v63  ;;  %v2999_v35 = vld [vmem:[#allocation5 + $0x220] sm:$0xff] }
 0x21f   :  { %935 = vmatmul.bf16.vlgmr.msrb.gmra.mxu3 %v3325_v5  ;;  %949 = vmatmul.bf16.vlgmr.msra.gmra.mxu0 %v3325_v5 }
 0x220   :  { %963 = vmatmul.bf16.vlgmr.msra.gmra.mxu1 %v3325_v5  ;;  %977 = vmatmul.bf16.vlgmr.msra.gmra.mxu2 %v3325_v5 }
 0x221   :  { %1484 = vmatpush.bf16.msra.mxu2 %v2637_v8  ;;  %1456 = vmatpush.bf16.msra.mxu0 %v2509_v16  ;;  %v2586_v8 = vld [vmem:[#allocation8 + $0x198] sm:$0xf0]  ;;  %v2469_v16 = vor.u32 %v2943_v13, %v2466_v14 }
 0x222   :  { %1470 = vmatpush.bf16.msra.mxu1 %v2573_v21  ;;  %1442 = vmatpush.bf16.msrb.mxu3 %v2445_v41  ;;  %v2589_v19 = vor.u32 %v2973_v7, %v2586_v8  ;;  %v2533_v21 = vor.u32 %v2959_v15, %v2530_v17  ;;  %v2925_v41 = vld [vmem:[#allocation8 + $0x14] sm:$0xf]  ;;  %v3010_v15 = vld [vmem:[#allocation5 + $0x278] sm:$0xff] }
 0x223   :  { %v3009_v17 = vld [vmem:[#allocation5 + $0x270] sm:$0xff] }
 0x225   :  { %1485 = vmatpush.bf16.msra.mxu2 %v2629_v11  ;;  %1457 = vmatpush.bf16.msra.mxu0 %v2501_v29  ;;  %v2421_v11 = vor.u32 %v2931_v20, %v2418_v10  ;;  %v2461_v29 = vor.u32 %v2941_v26, %v2458_v27  ;;  %v2993_v26 = vld [vmem:[#allocation5 + $0x1f0] sm:$0xff]  ;;  %v2992_v27 = vld [vmem:[#allocation5 + $0x1e8] sm:$0xff] }
 0x226   :  { %1471 = vmatpush.bf16.msra.mxu1 %v2565_v33  ;;  %1443 = vmatpush.bf16.msrb.mxu3 %v2437_v52  ;;  %v2525_v33 = vor.u32 %v2957_v28, %v2522_v30  ;;  %v2991_v28 = vld [vmem:[#allocation5 + $0x1e0] sm:$0xff]  ;;  %v3002_v30 = vld [vmem:[#allocation5 + $0x238] sm:$0xff] }
 0x229   :  { %1486 = vmatpush.bf16.msra.mxu2 %v2621_v25  ;;  %1458 = vmatpush.bf16.msra.mxu0 %v2493_v44  ;;  %v2413_v25 = vor.u32 %v2929_v23, %v2410_v24  ;;  %v2397_v44 = vor.u32 %v2925_v41, %v2394_v42  ;;  %v3004_v23 = vld [vmem:[#allocation5 + $0x248] sm:$0xff]  ;;  %v3003_v24 = vld [vmem:[#allocation5 + $0x240] sm:$0xff] }
 0x22a   :  { %1472 = vmatpush.bf16.msra.mxu1 %v2557_v48  ;;  %1444 = vmatpush.bf16.msrb.mxu3 %v2429_v0  ;;  %v2386_v48 = vld [vmem:[#allocation8 + $0x8] sm:$0xf0] }
 0x22b   :  { %v2389_v50 = vor.u32 %v2923_v47, %v2386_v48  ;;  %v2996_v42 = vld [vmem:[#allocation5 + $0x208] sm:$0xff]  ;;  %v2995_v47 = vld [vmem:[#allocation5 + $0x200] sm:$0xff] }
 0x22d   :  { %1487 = vmatpush.bf16.msra.mxu2 %v2613_v38  ;;  %1459 = vmatpush.bf16.msra.mxu0 %v2485_v56  ;;  %v2955_v38 = vld [vmem:[#allocation8 + $0x104] sm:$0xf] }
 0x22e   :  { %1473 = vmatpush.bf16.msra.mxu1 %v2549_v60  ;;  %1445 = vmatpush.bf16.msrb.mxu3 %v2421_v11  ;;  %v2517_v43 = vor.u32 %v2955_v38, %v2514_v40  ;;  %v762_v60 = vperm.slane %v757_v45, 3  ;;  %v2997_v38 = vld [vmem:[#allocation5 + $0x210] sm:$0xff] }
 0x231   :  { %1488 = vmatpush.bf16.msra.mxu2 %v2605_v51  ;;  %1460 = vmatpush.bf16.msra.mxu0 %v2477_v4  ;;  %v761_v51 = vperm.slane %v757_v45, 2 }
 0x232   :  { %1474 = vmatpush.bf16.msra.mxu1 %v2541_v9  ;;  %1446 = vmatpush.bf16.msrb.mxu3 %v2413_v25  ;;  %v2994_v25 = vld [vmem:[#allocation5 + $0x1f8] sm:$0xff] }
 0x235   :  { %1489 = vmatpush.bf16.msra.mxu2 %v2597_v61  ;;  %1461 = vmatpush.bf16.msra.mxu0 %v2469_v16 }
 0x236   :  { %1475 = vmatpush.bf16.msra.mxu1 %v2533_v21  ;;  %1447 = vmatpush.bf16.msrb.mxu3 %v2405_v34  ;;  %v3006_v21 = vld [vmem:[#allocation5 + $0x258] sm:$0xff]  ;;  %v3000_v34 = vld [vmem:[#allocation5 + $0x228] sm:$0xff] }
 0x239   :  { %1490 = vmatpush.bf16.msra.mxu2 %v2589_v19  ;;  %1462 = vmatpush.bf16.msra.mxu0 %v2461_v29  ;;  %v2990_v29 = vld [vmem:[#allocation5 + $0x1d8] sm:$0xff] }
 0x23a   :  { %1476 = vmatpush.bf16.msra.mxu1 %v2525_v33  ;;  %1448 = vmatpush.bf16.msrb.mxu3 %v2397_v44  ;;  %v2988_v33 = vld [vmem:[#allocation5 + $0x1c8] sm:$0xff] }
 0x23d   :  { %1491 = vmatpush.bf16.msra.mxu2 %v2581_v22  ;;  %1463 = vmatpush.bf16.msra.mxu0 %v2453_v39  ;;  %v3005_v22 = vld [vmem:[#allocation5 + $0x250] sm:$0xff]  ;;  %v1060_v39 = vld [vmem:[#allocation10 + $0x3] ss:$8 sm:$0x3] }
 0x23e   :  { %1477 = vmatpush.bf16.msra.mxu1 %v2517_v43  ;;  %1449 = vmatpush.bf16.msrb.mxu3 %v2389_v50  ;;  %v1062_v41 = vperm.slane %v1060_v39, 0 }
 0x29c   :  { %v950_v46 = vpop.f32.mrf.mxu0 }
 0x29d   :  { %v964_v49 = vpop.f32.mrf.mxu1  ;;  %v951_v53 = vadd.f32 %v950_v46, %v760_v36 }
 0x29e   :  { %v965_v55 = vadd.f32 %v964_v49, %v761_v51 }
 0x29f   :  { %v984_v62 = vmax.f32 %v951_v53, 0.0  ;;  %v3018_v53 = vld [vmem:[#allocation5 + $0x2b8] sm:$0xff] }
 0x2a0   :  { %v985_v0 = vmax.f32 %v965_v55, 0.0 }
 0x2a2   :  { %v936_v52 = vpop.f32.mrf.mxu3 }
 0x2a3   :  { %v978_v54 = vpop.f32.mrf.mxu2  ;;  %v937_v2 = vadd.f32 %v936_v52, %v759_v57 }
 0x2a4   :  { %v952_v56 = vpop.f32.mrf.mxu0  ;;  %v979_v4 = vadd.f32 %v978_v54, %v762_v60 }
 0x2a5   :  { %v953_v58 = vadd.f32 %v952_v56, %v760_v36  ;;  %v966_v59 = vpop.f32.mrf.mxu1  ;;  %v983_v20 = vmax.f32 %v937_v2, 0.0  ;;  %v3017_v56 = vld [vmem:[#allocation5 + $0x2b0] sm:$0xff] }
 0x2a6   :  { %v967_v61 = vadd.f32 %v966_v59, %v761_v51  ;;  %v986_v11 = vmax.f32 %v979_v4, 0.0  ;;  %v1063_v59 = vperm.slane %v1060_v39, 1 }
 0x2a7   :  { %v988_v63 = vmax.f32 %v953_v58, 0.0 }
 0x2a8   :  { %v989_v1 = vmax.f32 %v967_v61, 0.0 }
 0x2a9   :  { %v992_v3 = vpack.c.bf16 %v988_v63, %v984_v62 }
 0x2aa   :  { %v993_v6 = vpack.c.bf16 %v989_v1, %v985_v0  ;;  %v938_v7 = vpop.f32.mrf.mxu3 }
 0x2ab   :  { %v939_v8 = vadd.f32 %v938_v7, %v759_v57  ;;  %v980_v9 = vpop.f32.mrf.mxu2  ;;  %1408 = vmatmul.bf16.vlgmr.msrb.gmra.mxu0 %v992_v3 }
 0x2ac   :  { %v981_v19 = vadd.f32 %v980_v9, %v762_v60  ;;  %1422 = vmatmul.bf16.vlgmr.msrb.gmra.mxu1 %v993_v6  ;;  %1647 = vmatpush.bf16.msrb.mxu0 %v3002_v30 }
 0x2ad   :  { %v987_v10 = vmax.f32 %v939_v8, 0.0  ;;  %1742 = vmatpush.bf16.msrb.mxu1 %v3018_v53 }
 0x2ae   :  { %v990_v13 = vmax.f32 %v981_v19, 0.0 }
 0x2af   :  { %v991_v14 = vpack.c.bf16 %v987_v10, %v983_v20 }
 0x2b0   :  { %v994_v16 = vpack.c.bf16 %v990_v13, %v986_v11  ;;  %1648 = vmatpush.bf16.msrb.mxu0 %v3001_v32  ;;  %v1536_v32 = vld [vmem:[#allocation10 + $0x4] ss:$0 sm:$0xff] }
 0x2b1   :  { %1394 = vmatmul.bf16.vlgmr.msra.gmra.mxu3 %v991_v14  ;;  %1743 = vmatpush.bf16.msrb.mxu1 %v3017_v56 }
 0x2b2   :  { %1436 = vmatmul.bf16.vlgmr.msrb.gmra.mxu2 %v994_v16  ;;  %1633 = vmatpush.bf16.msra.mxu3 %v2994_v25  ;;  %v3011_v25 = vld [vmem:[#allocation5 + $0x280] sm:$0xff] }
 0x2b3   :  { %1804 = vmatpush.bf16.msrb.mxu2 %v3010_v15 }
 0x2b4   :  { %1649 = vmatpush.bf16.msrb.mxu0 %v3000_v34 }
 0x2b6   :  { %1634 = vmatpush.bf16.msra.mxu3 %v2993_v26  ;;  %v3026_v26 = vld [vmem:[#allocation5 + $0x2f8] sm:$0xff] }
 0x2b7   :  { %1805 = vmatpush.bf16.msrb.mxu2 %v3009_v17 }
 0x2b8   :  { %1650 = vmatpush.bf16.msrb.mxu0 %v2999_v35 }
 0x2ba   :  { %1635 = vmatpush.bf16.msra.mxu3 %v2992_v27  ;;  %v3025_v27 = vld [vmem:[#allocation5 + $0x2f0] sm:$0xff] }
 0x2bb   :  { %1806 = vmatpush.bf16.msrb.mxu2 %v3008_v12  ;;  %1464 = vmatmul.bf16.vlgmr.msra.gmra.mxu0 %v992_v3 }
 0x2bc   :  { %1478 = vmatmul.bf16.vlgmr.msra.gmra.mxu1 %v993_v6  ;;  %1651 = vmatpush.bf16.msrb.mxu0 %v2998_v37 }
 0x2be   :  { %1636 = vmatpush.bf16.msra.mxu3 %v2991_v28  ;;  %v3024_v28 = vld [vmem:[#allocation5 + $0x2e8] sm:$0xff] }
 0x2bf   :  { %1807 = vmatpush.bf16.msrb.mxu2 %v3007_v18  ;;  %v3016_v18 = vld [vmem:[#allocation5 + $0x2a8] sm:$0xff] }
 0x2c0   :  { %1652 = vmatpush.bf16.msrb.mxu0 %v2997_v38  ;;  %1744 = vmatpush.bf16.msrb.mxu1 %v3016_v18 }
 0x2c1   :  { %1450 = vmatmul.bf16.vlgmr.msrb.gmra.mxu3 %v991_v14 }
 0x2c2   :  { %1492 = vmatmul.bf16.vlgmr.msra.gmra.mxu2 %v994_v16  ;;  %1637 = vmatpush.bf16.msra.mxu3 %v2990_v29  ;;  %v3023_v29 = vld [vmem:[#allocation5 + $0x2e0] sm:$0xff] }
 0x2c3   :  { %1808 = vmatpush.bf16.msrb.mxu2 %v3006_v21  ;;  %v3015_v21 = vld [vmem:[#allocation5 + $0x2a0] sm:$0xff] }
 0x2c4   :  { %1653 = vmatpush.bf16.msrb.mxu0 %v2996_v42  ;;  %1745 = vmatpush.bf16.msrb.mxu1 %v3015_v21  ;;  %v3020_v42 = vld [vmem:[#allocation5 + $0x2c8] sm:$0xff] }
 0x2c6   :  { %1638 = vmatpush.bf16.msra.mxu3 %v2989_v31 }
 0x2c7   :  { %1809 = vmatpush.bf16.msrb.mxu2 %v3005_v22  ;;  %v3014_v22 = vld [vmem:[#allocation5 + $0x298] sm:$0xff] }
 0x2c8   :  { %1654 = vmatpush.bf16.msrb.mxu0 %v2995_v47  ;;  %1746 = vmatpush.bf16.msrb.mxu1 %v3014_v22  ;;  %v3031_v47 = vld [vmem:[#allocation5 + $0x320] sm:$0xff] }
 0x2ca   :  { %1639 = vmatpush.bf16.msra.mxu3 %v2988_v33 }
 0x2cb   :  { %1810 = vmatpush.bf16.msrb.mxu2 %v3004_v23  ;;  %v3013_v23 = vld [vmem:[#allocation5 + $0x290] sm:$0xff] }
 0x2cc   :  { %1747 = vmatpush.bf16.msrb.mxu1 %v3013_v23 }
 0x2cf   :  { %1811 = vmatpush.bf16.msrb.mxu2 %v3003_v24  ;;  %v3012_v24 = vld [vmem:[#allocation5 + $0x288] sm:$0xff] }
 0x2d0   :  { %1748 = vmatpush.bf16.msrb.mxu1 %v3012_v24 }
 0x2d2   :  { %1812 = vmatmul.bf16.vlgmr.msrb.gmra.mxu2 %v3325_v5  ;;  %v2987_v5 = vld [vmem:[#allocation5 + $0x1c0] sm:$0xff] }
 0x2d3   :  { %1640 = vmatpush.bf16.msra.mxu3 %v2987_v5 }
 0x2d4   :  { %1749 = vmatpush.bf16.msrb.mxu1 %v3011_v25 }
 0x2d7   :  { %1889 = vmatpush.bf16.msrb.mxu3 %v3026_v26 }
 0x2db   :  { %1890 = vmatpush.bf16.msrb.mxu3 %v3025_v27 }
 0x2df   :  { %1891 = vmatpush.bf16.msrb.mxu3 %v3024_v28 }
 0x2e3   :  { %1892 = vmatpush.bf16.msrb.mxu3 %v3023_v29 }
 0x328   :  { %v1409_v40 = vpop.f32.mrf.mxu0 }
 0x329   :  { %v1423_v43 = vpop.f32.mrf.mxu1 }
 0x330   :  { %v1411_v49 = vpop.f32.mrf.mxu0 }
 0x331   :  { %v1425_v50 = vpop.f32.mrf.mxu1 }
 0x334   :  { %v1395_v44 = vpop.f32.mrf.mxu3 }
 0x335   :  { %v1396_v45 = vadd.f32 %v1395_v44, %v1062_v41  ;;  %v1437_v46 = vpop.f32.mrf.mxu2  ;;  %v3034_v44 = vld [vmem:[#allocation5 + $0x338] sm:$0xff] }
 0x336   :  { %1971 = vmatpush.bf16.msra.mxu0 %v3034_v44 }
 0x337   :  { %v1410_v48 = vadd.f32 %v1409_v40, %v1396_v45  ;;  %v3022_v40 = vld [vmem:[#allocation5 + $0x2d8] sm:$0xff]  ;;  %v3033_v45 = vld [vmem:[#allocation5 + $0x330] sm:$0xff] }
 0x338   :  { %v1465_v61 = vpop.f32.mrf.mxu0  ;;  %1893 = vmatpush.bf16.msrb.mxu3 %v3022_v40 }
 0x339   :  { %v1424_v51 = vadd.f32 %v1423_v43, %v1410_v48  ;;  %v1479_v2 = vpop.f32.mrf.mxu1  ;;  %v3019_v43 = vld [vmem:[#allocation5 + $0x2c0] sm:$0xff] }
 0x33a   :  { %1972 = vmatpush.bf16.msra.mxu0 %v3033_v45 }
 0x33b   :  { %v1438_v57 = vadd.f32 %v1437_v46, %v1424_v51  ;;  %v3032_v46 = vld [vmem:[#allocation5 + $0x328] sm:$0xff] }
 0x33c   :  { %v1397_v36 = vpop.f32.mrf.mxu3 }
 0x33d   :  { %v1398_v52 = vadd.f32 %v1397_v36, %v1062_v41  ;;  %v1439_v54 = vpop.f32.mrf.mxu2  ;;  %v1498_v63 = vmax.f32 %v1438_v57, 0.0  ;;  %v3021_v41 = vld [vmem:[#allocation5 + $0x2d0] sm:$0xff]  ;;  %v1818_v36 = vld [vmem:[#allocation10 + $0x5] ss:$0 sm:$0xff] }
 0x33e   :  { %1894 = vmatpush.bf16.msrb.mxu3 %v3021_v41  ;;  %1973 = vmatpush.bf16.msra.mxu0 %v3032_v46 }
 0x33f   :  { %v1412_v55 = vadd.f32 %v1411_v49, %v1398_v52 }
 0x340   :  { %v1467_v19 = vpop.f32.mrf.mxu0 }
 0x341   :  { %v1426_v58 = vadd.f32 %v1425_v50, %v1412_v55  ;;  %v1481_v10 = vpop.f32.mrf.mxu1 }
 0x342   :  { %1895 = vmatpush.bf16.msrb.mxu3 %v3020_v42  ;;  %1974 = vmatpush.bf16.msra.mxu0 %v3031_v47 }
 0x343   :  { %v1440_v60 = vadd.f32 %v1439_v54, %v1426_v58 }
 0x344   :  { %v1451_v62 = vpop.f32.mrf.mxu3 }
 0x345   :  { %v1500_v0 = vmax.f32 %v1440_v60, 0.0  ;;  %v1452_v1 = vadd.f32 %v1451_v62, %v1063_v59  ;;  %v1493_v4 = vpop.f32.mrf.mxu2  ;;  %v3029_v60 = vld [vmem:[#allocation5 + $0x310] sm:$0xff]  ;;  %v3027_v62 = vld [vmem:[#allocation5 + $0x300] sm:$0xff] }
 0x346   :  { %1896 = vmatpush.bf16.msrb.mxu3 %v3019_v43 }
 0x347   :  { %v1502_v3 = vpack.c.bf16 %v1500_v0, %v1498_v63  ;;  %v1466_v6 = vadd.f32 %v1465_v61, %v1452_v1  ;;  %v3028_v61 = vld [vmem:[#allocation5 + $0x308] sm:$0xff]  ;;  %v1840_v0 = vld [vmem:[#allocation10 + $0x6] ss:$0 sm:$0xff] }
 0x349   :  { %1641 = vmatmul.bf16.vlgmr.msra.gmra.mxu3 %v1502_v3  ;;  %v1480_v8 = vadd.f32 %v1479_v2, %v1466_v6 }
 0x34b   :  { %v1494_v11 = vadd.f32 %v1493_v4, %v1480_v8  ;;  %v1922_v8 = vld [vmem:[#allocation10 + $0x7] ss:$0 sm:$0xff] }
 0x34c   :  { %v1453_v7 = vpop.f32.mrf.mxu3 }
 0x34d   :  { %v1454_v9 = vadd.f32 %v1453_v7, %v1063_v59  ;;  %v1495_v14 = vpop.f32.mrf.mxu2  ;;  %v1499_v16 = vmax.f32 %v1494_v11, 0.0  ;;  %v3030_v59 = vld [vmem:[#allocation5 + $0x318] sm:$0xff] }
 0x34e   :  { %1975 = vmatpush.bf16.msra.mxu0 %v3030_v59 }
 0x34f   :  { %v1468_v20 = vadd.f32 %v1467_v19, %v1454_v9 }
 0x351   :  { %v1482_v13 = vadd.f32 %v1481_v10, %v1468_v20 }
 0x352   :  { %1976 = vmatpush.bf16.msra.mxu0 %v3029_v60 }
 0x353   :  { %v1496_v15 = vadd.f32 %v1495_v14, %v1482_v13 }
 0x355   :  { %v1501_v17 = vmax.f32 %v1496_v15, 0.0  ;;  %v1813_v48 = vpop.f32.mrf.mxu2 }
 0x356   :  { %1977 = vmatpush.bf16.msra.mxu0 %v3028_v61 }
 0x357   :  { %v1503_v12 = vpack.c.bf16 %v1501_v17, %v1499_v16 }
 0x359   :  { %1655 = vmatmul.bf16.vlgmr.msrb.gmra.mxu0 %v1503_v12 }
 0x35a   :  { %1978 = vmatpush.bf16.msra.mxu0 %v3027_v62 }
 0x35d   :  { %v1815_v51 = vpop.f32.mrf.mxu2 }
 0x3cc   :  { %v1642_v30 = vpop.f32.mrf.mxu3 }
 0x3cd   :  { %v1643_v34 = vadd.f32 %v1642_v30, %v1536_v32 }
 0x3d4   :  { %v1644_v33 = vpop.f32.mrf.mxu3 }
 0x3d5   :  { %v1645_v5 = vadd.f32 %v1644_v33, %v1536_v32 }
 0x3d6   :  { %v1656_v31 = vpop.f32.mrf.mxu0 }
 0x3d7   :  { %v1657_v37 = vadd.f32 %v1656_v31, %v1643_v34 }
 0x3de   :  { %v1658_v35 = vpop.f32.mrf.mxu0 }
 0x3df   :  { %v1659_v38 = vadd.f32 %v1658_v35, %v1645_v5 }
 0x3e1   :  { %v1677_v39 = vpack.c.bf16 %v1659_v38, %v1657_v37 }
 0x3e3   :  { %1750 = vmatmul.bf16.vlgmr.msrb.gmra.mxu1 %v1677_v39 }
 0x460   :  { %v1751_v49 = vpop.f32.mrf.mxu1 }
 0x461   :  { %v1814_v50 = vadd.f32 %v1813_v48, %v1751_v49 }
 0x463   :  { %v1819_v53 = vadd.f32 %v1818_v36, %v1814_v50 }
 0x465   :  { %v1821_v56 = vmax.f32 %v1819_v53, 0.0 }
 0x468   :  { %v1753_v52 = vpop.f32.mrf.mxu1 }
 0x469   :  { %v1816_v54 = vadd.f32 %v1815_v51, %v1753_v52 }
 0x46b   :  { %v1820_v55 = vadd.f32 %v1818_v36, %v1816_v54 }
 0x46d   :  { %v1822_v57 = vmax.f32 %v1820_v55, 0.0 }
 0x46f   :  { %v1823_v58 = vpack.c.bf16 %v1822_v57, %v1821_v56 }
 0x471   :  { %1897 = vmatmul.bf16.vlgmr.msrb.gmra.mxu3 %v1823_v58 }
 0x4f4   :  { %v1898_v63 = vpop.f32.mrf.mxu3 }
 0x4f5   :  { %v1899_v1 = vadd.f32 %v1898_v63, %v1840_v0 }
 0x4f7   :  { %v1903_v4 = vmax.f32 %v1899_v1, 0.0 }
 0x4fc   :  { %v1900_v2 = vpop.f32.mrf.mxu3 }
 0x4fd   :  { %v1901_v3 = vadd.f32 %v1900_v2, %v1840_v0 }
 0x4ff   :  { %v1904_v6 = vmax.f32 %v1901_v3, 0.0 }
 0x501   :  { %v1905_v7 = vpack.c.bf16 %v1904_v6, %v1903_v4 }
 0x503   :  { %1979 = vmatmul.bf16.vlgmr.msra.gmra.mxu0 %v1905_v7 }
 0x580   :  { %v1980_v9 = vpop.f32.mrf.mxu0 }
 0x581   :  { %v1981_v19 = vadd.f32 %v1980_v9, %v1922_v8 }
 0x583   :  { %1985 = vst [vmem:[#allocation11] sm:$0xff] %v1981_v19 }
 0x588   :  { %v1982_v20 = vpop.f32.mrf.mxu0 }
 0x589   :  { %v1983_v10 = vadd.f32 %v1982_v20, %v1922_v8 }
 0x58b   :  { %1986 = vst [vmem:[#allocation11 + $0x8] sm:$0xff] %v1983_v10 }
 0x58c   :  { %1999 = dma.vmem_to_hbm [thread:$0]  %s1992_s4, 256, %s1994_s25, [#allocation4], %s3213_s30, %s3213_s30, %s3214_s6  }
 0x58d   :  { %3207 = dma.done.wait [#allocation4], 256  }
 0x58e   :  { %3208 = vsyncadd [#allocation4], 4294967040 }
 0x58f   :  { %2004 = vsyncpa [#allocation3], 1 }
 0x590   :  { %2005 = vsyncpa [#allocation6], 1 }
 0x591   :  { %2006 = vsyncpa [#allocation9], 1 }
 0x592   :  { %2007 = vsyncpa [#allocation4], 1 }

</bundles_post_ra>
